<compile_context>
chip_gen: v7x
topology: tpu7x:2x2x1
jax: 0.10.0
libtpu: 0.0.40
codegen_flags: <defaults>
</compile_context>

<pallas_src>
import jax
import jax.numpy as jnp
from jax import lax
from jax.experimental import pallas as pl
from jax.experimental.pallas import tpu as pltpu


def _round_up(x, m):
    return (x + m - 1) // m * m


# ----------------------------- Pallas kernel -------------------------------

def encoder_lstm_kernel(x0_ref, wih_ref, whh_ref, b_ref,
                        out_ref, hn_ref, cn_ref,
                        x_scr, xw_scr):
    """Whole LSTM stack. Grid axis 0 = layer (sequential, 'arbitrary')."""
    layer = pl.program_id(0)
    n_layers = pl.num_programs(0)
    seq, batch, dp = x_scr.shape          # dp = padded input width
    hp = hn_ref.shape[-1]                 # hp = padded hidden width (mult of 128)

    # Layer 0 input = embedded tokens; later layers read the h written below.
    @pl.when(layer == 0)
    def _():
        x_scr[...] = x0_ref[...]

    w_ih = wih_ref[0]                     # (dp, 4*hp)
    w_hh = whh_ref[0]                     # (hp, 4*hp)
    b = b_ref[0]                          # (1, 4*hp)

    # Hoisted, time-independent input projection: one big MXU matmul,
    # bias folded in (no per-step broadcast on the recurrent path).
    x_flat = x_scr[...].reshape(seq * batch, dp)
    xw = jnp.dot(x_flat.astype(w_ih.dtype), w_ih,
                 preferred_element_type=jnp.float32) + b
    xw_scr[...] = xw.reshape(seq, batch, 4 * hp)

    h0 = jnp.zeros((batch, hp), jnp.float32)
    c0 = jnp.zeros((batch, hp), jnp.float32)

    def step(t, carry):
        h, c = carry
        # Recurrent path: only h @ W_hh + precomputed xW[t].
        gates = xw_scr[t] + jnp.dot(h.astype(w_hh.dtype), w_hh,
                                    preferred_element_type=jnp.float32)
        # PyTorch gate order [i, f, g, o]; each slice is a lane-aligned
        # 128-multiple sub-view (hp % 128 == 0).
        i_g = jax.nn.sigmoid(gates[:, 0 * hp:1 * hp])
        f_g = jax.nn.sigmoid(gates[:, 1 * hp:2 * hp])
        g_g = jnp.tanh(gates[:, 2 * hp:3 * hp])
        o_g = jax.nn.sigmoid(gates[:, 3 * hp:4 * hp])
        c_new = f_g * c + i_g * g_g
        h_new = o_g * jnp.tanh(c_new)
        # Becomes next layer's input (and, at the last layer, the output slab).
        x_scr[t, :, pl.ds(0, hp)] = h_new
        return h_new, c_new

    h_fin, c_fin = lax.fori_loop(0, seq, step, (h0, c0), unroll=True)

    hn_ref[0] = h_fin                     # per-layer final states
    cn_ref[0] = c_fin

    @pl.when(layer == n_layers - 1)
    def _():
        out_ref[...] = x_scr[:, :, pl.ds(0, hp)]


# ----------------------------- weight packing -------------------------------

def _pad_gate_weight(w, in_dim, in_pad, hid, hid_pad, dtype):
    """(4*hid, in_dim) torch layout -> (in_pad, 4*hid_pad), zero padded
    per-gate so x @ W yields [i|f|g|o] blocks of width hid_pad."""
    w4 = jnp.asarray(w, jnp.float32).reshape(4, hid, in_dim)
    wp = jnp.zeros((4, hid_pad, in_pad), jnp.float32)
    wp = wp.at[:, :hid, :in_dim].set(w4)
    return jnp.transpose(wp, (2, 0, 1)).reshape(in_pad, 4 * hid_pad).astype(dtype)


def _pad_gate_bias(b, hid, hid_pad):
    b4 = jnp.asarray(b, jnp.float32).reshape(4, hid)
    bp = jnp.zeros((4, hid_pad), jnp.float32)
    bp = bp.at[:, :hid].set(b4)
    return bp.reshape(4 * hid_pad)


# ----------------------------- Encoder forward ------------------------------

def encoder_forward(src, params, n_layers, emb_dim, hid_dim,
                    matmul_dtype=jnp.float32):
    """src: (seq_len, batch) int32 ids. Returns (outputs, (h_n, c_n))."""
    seq, batch = src.shape
    hp = _round_up(hid_dim, 128)
    ep = _round_up(emb_dim, 128)
    dp = max(ep, hp)                       # common padded input width

    # Embedding lookup + (identity) dropout, padded to dp lanes.
    emb = jnp.take(params["embedding"], src, axis=0).astype(jnp.float32)
    x0 = jnp.zeros((seq, batch, dp), jnp.float32).at[:, :, :emb_dim].set(emb)

    in_dims = [emb_dim] + [hid_dim] * (n_layers - 1)
    wih = jnp.stack([
        _pad_gate_weight(params[f"w_ih_l{l}"], in_dims[l], dp,
                         hid_dim, hp, matmul_dtype)
        for l in range(n_layers)])                        # (L, dp, 4hp)
    whh = jnp.stack([
        _pad_gate_weight(params[f"w_hh_l{l}"], hid_dim, hp,
                         hid_dim, hp, matmul_dtype)
        for l in range(n_layers)])                        # (L, hp, 4hp)
    b = jnp.stack([
        _pad_gate_bias(params[f"b_ih_l{l}"] + params[f"b_hh_l{l}"],
                       hid_dim, hp)
        for l in range(n_layers)])[:, None, :]            # (L, 1, 4hp)

    out_shapes = (
        jax.ShapeDtypeStruct((seq, batch, hp), jnp.float32),
        jax.ShapeDtypeStruct((n_layers, batch, hp), jnp.float32),
        jax.ShapeDtypeStruct((n_layers, batch, hp), jnp.float32),
    )

    grid_spec = pltpu.PrefetchScalarGridSpec(
        num_scalar_prefetch=0,
        grid=(n_layers,),
        in_specs=[
            pl.BlockSpec((seq, batch, dp), lambda l: (0, 0, 0)),   # x0 (resident)
            pl.BlockSpec((1, dp, 4 * hp), lambda l: (l, 0, 0)),    # W_ih (per layer)
            pl.BlockSpec((1, hp, 4 * hp), lambda l: (l, 0, 0)),    # W_hh (per layer)
            pl.BlockSpec((1, 1, 4 * hp), lambda l: (l, 0, 0)),     # bias (per layer)
        ],
        out_specs=[
            pl.BlockSpec((seq, batch, hp), lambda l: (0, 0, 0)),   # outputs (resident)
            pl.BlockSpec((1, batch, hp), lambda l: (l, 0, 0)),     # h_n
            pl.BlockSpec((1, batch, hp), lambda l: (l, 0, 0)),     # c_n
        ],
        scratch_shapes=[
            pltpu.VMEM((seq, batch, dp), jnp.float32),       # layer input carry
            pltpu.VMEM((seq, batch, 4 * hp), jnp.float32),   # precomputed x@Wih+b
        ],
    )

    outputs_p, hn_p, cn_p = pl.pallas_call(
        encoder_lstm_kernel,
        out_shape=out_shapes,
        grid_spec=grid_spec,
        compiler_params=pltpu.CompilerParams(
            dimension_semantics=("arbitrary",)),   # layers are sequential
    )(x0, wih, whh, b)

    outputs = outputs_p[:, :, :hid_dim]
    h_n = hn_p[:, :, :hid_dim]
    c_n = cn_p[:, :, :hid_dim]
    return outputs, (h_n, c_n)


# ----------------------------- Pure-JAX reference ---------------------------

def lstm_layer_ref(x, w_ih, w_hh, b_ih, b_hh):
    hid = w_hh.shape[1]

    def step(carry, x_t):
        h, c = carry
        gates = x_t @ w_ih.T + h @ w_hh.T + b_ih + b_hh
        i_g = jax.nn.sigmoid(gates[:, 0 * hid:1 * hid])
        f_g = jax.nn.sigmoid(gates[:, 1 * hid:2 * hid])
        g_g = jnp.tanh(gates[:, 2 * hid:3 * hid])
        o_g = jax.nn.sigmoid(gates[:, 3 * hid:4 * hid])
        c_new = f_g * c + i_g * g_g
        h_new = o_g * jnp.tanh(c_new)
        return (h_new, c_new), h_new

    batch = x.shape[1]
    init = (jnp.zeros((batch, hid), jnp.float32),
            jnp.zeros((batch, hid), jnp.float32))
    (h_n, c_n), outs = jax.lax.scan(step, init, x)
    return outs, h_n, c_n


def encoder_ref(src, params, n_layers):
    x = jnp.take(params["embedding"], src, axis=0).astype(jnp.float32)
    h_list, c_list = [], []
    for layer in range(n_layers):
        x, h_n, c_n = lstm_layer_ref(
            x,
            params[f"w_ih_l{layer}"], params[f"w_hh_l{layer}"],
            params[f"b_ih_l{layer}"], params[f"b_hh_l{layer}"],
        )
        h_list.append(h_n)
        c_list.append(c_n)
    return x, (jnp.stack(h_list), jnp.stack(c_list))


# ---------------------------------- Main ------------------------------------

if __name__ == "__main__":
    # Small, shape-consistent config.
    input_dim = 50      # vocab size
    emb_dim = 16
    hid_dim = 32
    n_layers = 2
    seq_len = 8
    batch = 8

    key = jax.random.PRNGKey(0)
    keys = jax.random.split(key, 2 + 4 * n_layers)

    params = {"embedding": 0.1 * jax.random.normal(
        keys[0], (input_dim, emb_dim), jnp.float32)}
    k_idx = 1
    in_dims = [emb_dim] + [hid_dim] * (n_layers - 1)
    for layer in range(n_layers):
        params[f"w_ih_l{layer}"] = 0.1 * jax.random.normal(
            keys[k_idx], (4 * hid_dim, in_dims[layer]), jnp.float32); k_idx += 1
        params[f"w_hh_l{layer}"] = 0.1 * jax.random.normal(
            keys[k_idx], (4 * hid_dim, hid_dim), jnp.float32); k_idx += 1
        params[f"b_ih_l{layer}"] = 0.01 * jax.random.normal(
            keys[k_idx], (4 * hid_dim,), jnp.float32); k_idx += 1
        params[f"b_hh_l{layer}"] = 0.01 * jax.random.normal(
            keys[k_idx], (4 * hid_dim,), jnp.float32); k_idx += 1

    src = jax.random.randint(keys[k_idx], (seq_len, batch), 0, input_dim,
                             dtype=jnp.int32)

    outputs, (h_n, c_n) = encoder_forward(src, params, n_layers,
                                          emb_dim, hid_dim)
    jax.block_until_ready((outputs, h_n, c_n))

    # Validate against pure-JAX reference.
    outputs_r, (h_r, c_r) = encoder_ref(src, params, n_layers)
    assert outputs.shape == (seq_len, batch, hid_dim)
    assert h_n.shape == (n_layers, batch, hid_dim)
    assert c_n.shape == (n_layers, batch, hid_dim)
    assert jnp.allclose(outputs, outputs_r, atol=1e-5)
    assert jnp.allclose(h_n, h_r, atol=1e-5)
    assert jnp.allclose(c_n, c_r, atol=1e-5)

    print("KERNEL_OK")
</pallas_src>

<mosaic_0001>
module attributes {stable_mosaic.version = 11 : i64} {
  func.func @encoder_lstm_kernel(%arg0: i32, %arg1: memref<8x8x128xf32, #tpu.memory_space<vmem>>, %arg2: memref<1x128x512xf32, #tpu.memory_space<vmem>>, %arg3: memref<1x128x512xf32, #tpu.memory_space<vmem>>, %arg4: memref<1x1x512xf32, #tpu.memory_space<vmem>>, %arg5: memref<8x8x128xf32, #tpu.memory_space<vmem>>, %arg6: memref<1x8x128xf32, #tpu.memory_space<vmem>>, %arg7: memref<1x8x128xf32, #tpu.memory_space<vmem>>, %arg8: memref<8x8x128xf32, #tpu.memory_space<vmem>>, %arg9: memref<8x8x512xf32, #tpu.memory_space<vmem>>) attributes {dimension_semantics = [#tpu.dimension_semantics<arbitrary>], iteration_bounds = array<i64: 2>, scalar_prefetch = 0 : i64, scratch_operands = 2 : i64, tpu.core_type = #tpu.core_type<tc>, window_params = [{pipeline_mode = #tpu.pipeline_mode<synchronous>, transform_indices = @transform_0, window_bounds = array<i64: 8, 8, 128>}, {transform_indices = @transform_1, window_bounds = array<i64: 1, 128, 512>}, {transform_indices = @transform_2, window_bounds = array<i64: 1, 128, 512>}, {transform_indices = @transform_3, window_bounds = array<i64: 1, 1, 512>}, {pipeline_mode = #tpu.pipeline_mode<synchronous>, transform_indices = @transform_4, window_bounds = array<i64: 8, 8, 128>}, {transform_indices = @transform_5, window_bounds = array<i64: 1, 8, 128>}, {transform_indices = @transform_6, window_bounds = array<i64: 1, 8, 128>}]} {
    %c0_i32 = arith.constant 0 : i32
    %0 = arith.cmpi eq, %arg0, %c0_i32 : i32
    %1 = arith.extui %0 : i1 to i32
    %c0_i32_0 = arith.constant 0 : i32
    %2 = arith.cmpi ne, %1, %c0_i32_0 : i32
    scf.if %2 {
      %c0_90 = arith.constant 0 : index
      %c0_91 = arith.constant 0 : index
      %c0_92 = arith.constant 0 : index
      %299 = vector.load %arg1[%c0_90, %c0_91, %c0_92] : memref<8x8x128xf32, #tpu.memory_space<vmem>>, vector<8x8x128xf32>
      %c0_93 = arith.constant 0 : index
      %c0_94 = arith.constant 0 : index
      %c0_95 = arith.constant 0 : index
      %300 = vector.load %arg8[%c0_93, %c0_94, %c0_95] : memref<8x8x128xf32, #tpu.memory_space<vmem>>, vector<8x8x128xf32>
      tpu.vector_store %arg8[%c0_93, %c0_94, %c0_95], %299 {strides = array<i32>} : memref<8x8x128xf32, #tpu.memory_space<vmem>>, vector<8x8x128xf32>,
    } else {
    }
    %c0 = arith.constant 0 : index
    %c0_1 = arith.constant 0 : index
    %c0_2 = arith.constant 0 : index
    %3 = vector.load %arg2[%c0, %c0_1, %c0_2] : memref<1x128x512xf32, #tpu.memory_space<vmem>>, vector<1x128x512xf32>
    %4 = vector.shape_cast %3 : vector<1x128x512xf32> to vector<128x512xf32>
    %c0_3 = arith.constant 0 : index
    %c0_4 = arith.constant 0 : index
    %c0_5 = arith.constant 0 : index
    %5 = vector.load %arg3[%c0_3, %c0_4, %c0_5] : memref<1x128x512xf32, #tpu.memory_space<vmem>>, vector<1x128x512xf32>
    %6 = vector.shape_cast %5 : vector<1x128x512xf32> to vector<128x512xf32>
    %c0_6 = arith.constant 0 : index
    %c0_7 = arith.constant 0 : index
    %c0_8 = arith.constant 0 : index
    %7 = vector.load %arg4[%c0_6, %c0_7, %c0_8] : memref<1x1x512xf32, #tpu.memory_space<vmem>>, vector<1x1x512xf32>
    %8 = vector.shape_cast %7 : vector<1x1x512xf32> to vector<1x512xf32>
    %c0_9 = arith.constant 0 : index
    %c0_10 = arith.constant 0 : index
    %c0_11 = arith.constant 0 : index
    %9 = vector.load %arg8[%c0_9, %c0_10, %c0_11] : memref<8x8x128xf32, #tpu.memory_space<vmem>>, vector<8x8x128xf32>
    %10 = vector.shape_cast %9 : vector<8x8x128xf32> to vector<64x128xf32>
    %cst = arith.constant dense<0.000000e+00> : vector<64x512xf32>
    %11 = tpu.matmul %10, %4, %cst {dimension_numbers = #tpu.dot_dimension_numbers<[1], [0], [0], [1], [0, 0, 1, 1], [], []>} : vector<64x128xf32>, vector<128x512xf32>, vector<64x512xf32> -> vector<64x512xf32>
    %12 = vector.broadcast %8 : vector<1x512xf32> to vector<64x512xf32>
    %13 = arith.addf %11, %12 : vector<64x512xf32>
    %14 = vector.shape_cast %13 : vector<64x512xf32> to vector<8x8x512xf32>
    %c0_12 = arith.constant 0 : index
    %c0_13 = arith.constant 0 : index
    %c0_14 = arith.constant 0 : index
    %15 = vector.load %arg9[%c0_12, %c0_13, %c0_14] : memref<8x8x512xf32, #tpu.memory_space<vmem>>, vector<8x8x512xf32>
    tpu.vector_store %arg9[%c0_12, %c0_13, %c0_14], %14 {strides = array<i32>} : memref<8x8x512xf32, #tpu.memory_space<vmem>>, vector<8x8x512xf32>,
    %cst_15 = arith.constant 0.000000e+00 : f32
    %16 = vector.broadcast %cst_15 : f32 to vector<8x128xf32>
    %cst_16 = arith.constant 0.000000e+00 : f32
    %17 = vector.broadcast %cst_16 : f32 to vector<8x128xf32>
    %c0_i32_17 = arith.constant 0 : i32
    %18 = arith.index_cast %c0_i32_17 : i32 to index
    %c0_18 = arith.constant 0 : index
    %c0_19 = arith.constant 0 : index
    %19 = vector.load %arg9[%18, %c0_18, %c0_19] : memref<8x8x512xf32, #tpu.memory_space<vmem>>, vector<1x8x512xf32>
    %20 = vector.shape_cast %19 : vector<1x8x512xf32> to vector<8x512xf32>
    %cst_20 = arith.constant dense<0.000000e+00> : vector<8x512xf32>
    %21 = tpu.matmul %16, %6, %cst_20 {dimension_numbers = #tpu.dot_dimension_numbers<[1], [0], [0], [1], [0, 0, 1, 1], [], []>} : vector<8x128xf32>, vector<128x512xf32>, vector<8x512xf32> -> vector<8x512xf32>
    %22 = arith.addf %20, %21 : vector<8x512xf32>
    %23 = vector.extract_strided_slice %22 {offsets = [0, 0], sizes = [8, 128], strides = [1, 1]} : vector<8x512xf32> to vector<8x128xf32>
    %24 = arith.negf %23 : vector<8x128xf32>
    %25 = math.exp %24 : vector<8x128xf32>
    %cst_21 = arith.constant 1.000000e+00 : f32
    %26 = vector.broadcast %cst_21 : f32 to vector<8x128xf32>
    %27 = arith.addf %26, %25 : vector<8x128xf32>
    %28 = arith.divf %26, %27 : vector<8x128xf32>
    %29 = vector.extract_strided_slice %22 {offsets = [0, 128], sizes = [8, 128], strides = [1, 1]} : vector<8x512xf32> to vector<8x128xf32>
    %30 = arith.negf %29 : vector<8x128xf32>
    %31 = math.exp %30 : vector<8x128xf32>
    %cst_22 = arith.constant 1.000000e+00 : f32
    %32 = vector.broadcast %cst_22 : f32 to vector<8x128xf32>
    %33 = arith.addf %32, %31 : vector<8x128xf32>
    %34 = arith.divf %32, %33 : vector<8x128xf32>
    %35 = vector.extract_strided_slice %22 {offsets = [0, 256], sizes = [8, 128], strides = [1, 1]} : vector<8x512xf32> to vector<8x128xf32>
    %36 = math.tanh %35 : vector<8x128xf32>
    %37 = vector.extract_strided_slice %22 {offsets = [0, 384], sizes = [8, 128], strides = [1, 1]} : vector<8x512xf32> to vector<8x128xf32>
    %38 = arith.negf %37 : vector<8x128xf32>
    %39 = math.exp %38 : vector<8x128xf32>
    %cst_23 = arith.constant 1.000000e+00 : f32
    %40 = vector.broadcast %cst_23 : f32 to vector<8x128xf32>
    %41 = arith.addf %40, %39 : vector<8x128xf32>
    %42 = arith.divf %40, %41 : vector<8x128xf32>
    %43 = arith.mulf %34, %17 : vector<8x128xf32>
    %44 = arith.mulf %28, %36 : vector<8x128xf32>
    %45 = arith.addf %43, %44 : vector<8x128xf32>
    %46 = math.tanh %45 : vector<8x128xf32>
    %47 = arith.mulf %42, %46 : vector<8x128xf32>
    %48 = arith.index_cast %c0_i32_17 : i32 to index
    %c0_24 = arith.constant 0 : index
    %c0_25 = arith.constant 0 : index
    %49 = vector.load %arg8[%48, %c0_24, %c0_25] : memref<8x8x128xf32, #tpu.memory_space<vmem>>, vector<1x8x128xf32>
    %50 = vector.shape_cast %49 : vector<1x8x128xf32> to vector<8x128xf32>
    %51 = vector.shape_cast %47 : vector<8x128xf32> to vector<1x8x128xf32>
    tpu.vector_store %arg8[%48, %c0_24, %c0_25], %51 {strides = array<i32>} : memref<8x8x128xf32, #tpu.memory_space<vmem>>, vector<1x8x128xf32>,
    %c1_i32 = arith.constant 1 : i32
    %52 = arith.index_cast %c1_i32 : i32 to index
    %c0_26 = arith.constant 0 : index
    %c0_27 = arith.constant 0 : index
    %53 = vector.load %arg9[%52, %c0_26, %c0_27] : memref<8x8x512xf32, #tpu.memory_space<vmem>>, vector<1x8x512xf32>
    %54 = vector.shape_cast %53 : vector<1x8x512xf32> to vector<8x512xf32>
    %cst_28 = arith.constant dense<0.000000e+00> : vector<8x512xf32>
    %55 = tpu.matmul %47, %6, %cst_28 {dimension_numbers = #tpu.dot_dimension_numbers<[1], [0], [0], [1], [0, 0, 1, 1], [], []>} : vector<8x128xf32>, vector<128x512xf32>, vector<8x512xf32> -> vector<8x512xf32>
    %56 = arith.addf %54, %55 : vector<8x512xf32>
    %57 = vector.extract_strided_slice %56 {offsets = [0, 0], sizes = [8, 128], strides = [1, 1]} : vector<8x512xf32> to vector<8x128xf32>
    %58 = arith.negf %57 : vector<8x128xf32>
    %59 = math.exp %58 : vector<8x128xf32>
    %cst_29 = arith.constant 1.000000e+00 : f32
    %60 = vector.broadcast %cst_29 : f32 to vector<8x128xf32>
    %61 = arith.addf %60, %59 : vector<8x128xf32>
    %62 = arith.divf %60, %61 : vector<8x128xf32>
    %63 = vector.extract_strided_slice %56 {offsets = [0, 128], sizes = [8, 128], strides = [1, 1]} : vector<8x512xf32> to vector<8x128xf32>
    %64 = arith.negf %63 : vector<8x128xf32>
    %65 = math.exp %64 : vector<8x128xf32>
    %cst_30 = arith.constant 1.000000e+00 : f32
    %66 = vector.broadcast %cst_30 : f32 to vector<8x128xf32>
    %67 = arith.addf %66, %65 : vector<8x128xf32>
    %68 = arith.divf %66, %67 : vector<8x128xf32>
    %69 = vector.extract_strided_slice %56 {offsets = [0, 256], sizes = [8, 128], strides = [1, 1]} : vector<8x512xf32> to vector<8x128xf32>
    %70 = math.tanh %69 : vector<8x128xf32>
    %71 = vector.extract_strided_slice %56 {offsets = [0, 384], sizes = [8, 128], strides = [1, 1]} : vector<8x512xf32> to vector<8x128xf32>
    %72 = arith.negf %71 : vector<8x128xf32>
    %73 = math.exp %72 : vector<8x128xf32>
    %cst_31 = arith.constant 1.000000e+00 : f32
    %74 = vector.broadcast %cst_31 : f32 to vector<8x128xf32>
    %75 = arith.addf %74, %73 : vector<8x128xf32>
    %76 = arith.divf %74, %75 : vector<8x128xf32>
    %77 = arith.mulf %68, %45 : vector<8x128xf32>
    %78 = arith.mulf %62, %70 : vector<8x128xf32>
    %79 = arith.addf %77, %78 : vector<8x128xf32>
    %80 = math.tanh %79 : vector<8x128xf32>
    %81 = arith.mulf %76, %80 : vector<8x128xf32>
    %82 = arith.index_cast %c1_i32 : i32 to index
    %c0_32 = arith.constant 0 : index
    %c0_33 = arith.constant 0 : index
    %83 = vector.load %arg8[%82, %c0_32, %c0_33] : memref<8x8x128xf32, #tpu.memory_space<vmem>>, vector<1x8x128xf32>
    %84 = vector.shape_cast %83 : vector<1x8x128xf32> to vector<8x128xf32>
    %85 = vector.shape_cast %81 : vector<8x128xf32> to vector<1x8x128xf32>
    tpu.vector_store %arg8[%82, %c0_32, %c0_33], %85 {strides = array<i32>} : memref<8x8x128xf32, #tpu.memory_space<vmem>>, vector<1x8x128xf32>,
    %c2_i32 = arith.constant 2 : i32
    %86 = arith.index_cast %c2_i32 : i32 to index
    %c0_34 = arith.constant 0 : index
    %c0_35 = arith.constant 0 : index
    %87 = vector.load %arg9[%86, %c0_34, %c0_35] : memref<8x8x512xf32, #tpu.memory_space<vmem>>, vector<1x8x512xf32>
    %88 = vector.shape_cast %87 : vector<1x8x512xf32> to vector<8x512xf32>
    %cst_36 = arith.constant dense<0.000000e+00> : vector<8x512xf32>
    %89 = tpu.matmul %81, %6, %cst_36 {dimension_numbers = #tpu.dot_dimension_numbers<[1], [0], [0], [1], [0, 0, 1, 1], [], []>} : vector<8x128xf32>, vector<128x512xf32>, vector<8x512xf32> -> vector<8x512xf32>
    %90 = arith.addf %88, %89 : vector<8x512xf32>
    %91 = vector.extract_strided_slice %90 {offsets = [0, 0], sizes = [8, 128], strides = [1, 1]} : vector<8x512xf32> to vector<8x128xf32>
    %92 = arith.negf %91 : vector<8x128xf32>
    %93 = math.exp %92 : vector<8x128xf32>
    %cst_37 = arith.constant 1.000000e+00 : f32
    %94 = vector.broadcast %cst_37 : f32 to vector<8x128xf32>
    %95 = arith.addf %94, %93 : vector<8x128xf32>
    %96 = arith.divf %94, %95 : vector<8x128xf32>
    %97 = vector.extract_strided_slice %90 {offsets = [0, 128], sizes = [8, 128], strides = [1, 1]} : vector<8x512xf32> to vector<8x128xf32>
    %98 = arith.negf %97 : vector<8x128xf32>
    %99 = math.exp %98 : vector<8x128xf32>
    %cst_38 = arith.constant 1.000000e+00 : f32
    %100 = vector.broadcast %cst_38 : f32 to vector<8x128xf32>
    %101 = arith.addf %100, %99 : vector<8x128xf32>
    %102 = arith.divf %100, %101 : vector<8x128xf32>
    %103 = vector.extract_strided_slice %90 {offsets = [0, 256], sizes = [8, 128], strides = [1, 1]} : vector<8x512xf32> to vector<8x128xf32>
    %104 = math.tanh %103 : vector<8x128xf32>
    %105 = vector.extract_strided_slice %90 {offsets = [0, 384], sizes = [8, 128], strides = [1, 1]} : vector<8x512xf32> to vector<8x128xf32>
    %106 = arith.negf %105 : vector<8x128xf32>
    %107 = math.exp %106 : vector<8x128xf32>
    %cst_39 = arith.constant 1.000000e+00 : f32
    %108 = vector.broadcast %cst_39 : f32 to vector<8x128xf32>
    %109 = arith.addf %108, %107 : vector<8x128xf32>
    %110 = arith.divf %108, %109 : vector<8x128xf32>
    %111 = arith.mulf %102, %79 : vector<8x128xf32>
    %112 = arith.mulf %96, %104 : vector<8x128xf32>
    %113 = arith.addf %111, %112 : vector<8x128xf32>
    %114 = math.tanh %113 : vector<8x128xf32>
    %115 = arith.mulf %110, %114 : vector<8x128xf32>
    %116 = arith.index_cast %c2_i32 : i32 to index
    %c0_40 = arith.constant 0 : index
    %c0_41 = arith.constant 0 : index
    %117 = vector.load %arg8[%116, %c0_40, %c0_41] : memref<8x8x128xf32, #tpu.memory_space<vmem>>, vector<1x8x128xf32>
    %118 = vector.shape_cast %117 : vector<1x8x128xf32> to vector<8x128xf32>
    %119 = vector.shape_cast %115 : vector<8x128xf32> to vector<1x8x128xf32>
    tpu.vector_store %arg8[%116, %c0_40, %c0_41], %119 {strides = array<i32>} : memref<8x8x128xf32, #tpu.memory_space<vmem>>, vector<1x8x128xf32>,
    %c3_i32 = arith.constant 3 : i32
    %120 = arith.index_cast %c3_i32 : i32 to index
    %c0_42 = arith.constant 0 : index
    %c0_43 = arith.constant 0 : index
    %121 = vector.load %arg9[%120, %c0_42, %c0_43] : memref<8x8x512xf32, #tpu.memory_space<vmem>>, vector<1x8x512xf32>
    %122 = vector.shape_cast %121 : vector<1x8x512xf32> to vector<8x512xf32>
    %cst_44 = arith.constant dense<0.000000e+00> : vector<8x512xf32>
    %123 = tpu.matmul %115, %6, %cst_44 {dimension_numbers = #tpu.dot_dimension_numbers<[1], [0], [0], [1], [0, 0, 1, 1], [], []>} : vector<8x128xf32>, vector<128x512xf32>, vector<8x512xf32> -> vector<8x512xf32>
    %124 = arith.addf %122, %123 : vector<8x512xf32>
    %125 = vector.extract_strided_slice %124 {offsets = [0, 0], sizes = [8, 128], strides = [1, 1]} : vector<8x512xf32> to vector<8x128xf32>
    %126 = arith.negf %125 : vector<8x128xf32>
    %127 = math.exp %126 : vector<8x128xf32>
    %cst_45 = arith.constant 1.000000e+00 : f32
    %128 = vector.broadcast %cst_45 : f32 to vector<8x128xf32>
    %129 = arith.addf %128, %127 : vector<8x128xf32>
    %130 = arith.divf %128, %129 : vector<8x128xf32>
    %131 = vector.extract_strided_slice %124 {offsets = [0, 128], sizes = [8, 128], strides = [1, 1]} : vector<8x512xf32> to vector<8x128xf32>
    %132 = arith.negf %131 : vector<8x128xf32>
    %133 = math.exp %132 : vector<8x128xf32>
    %cst_46 = arith.constant 1.000000e+00 : f32
    %134 = vector.broadcast %cst_46 : f32 to vector<8x128xf32>
    %135 = arith.addf %134, %133 : vector<8x128xf32>
    %136 = arith.divf %134, %135 : vector<8x128xf32>
    %137 = vector.extract_strided_slice %124 {offsets = [0, 256], sizes = [8, 128], strides = [1, 1]} : vector<8x512xf32> to vector<8x128xf32>
    %138 = math.tanh %137 : vector<8x128xf32>
    %139 = vector.extract_strided_slice %124 {offsets = [0, 384], sizes = [8, 128], strides = [1, 1]} : vector<8x512xf32> to vector<8x128xf32>
    %140 = arith.negf %139 : vector<8x128xf32>
    %141 = math.exp %140 : vector<8x128xf32>
    %cst_47 = arith.constant 1.000000e+00 : f32
    %142 = vector.broadcast %cst_47 : f32 to vector<8x128xf32>
    %143 = arith.addf %142, %141 : vector<8x128xf32>
    %144 = arith.divf %142, %143 : vector<8x128xf32>
    %145 = arith.mulf %136, %113 : vector<8x128xf32>
    %146 = arith.mulf %130, %138 : vector<8x128xf32>
    %147 = arith.addf %145, %146 : vector<8x128xf32>
    %148 = math.tanh %147 : vector<8x128xf32>
    %149 = arith.mulf %144, %148 : vector<8x128xf32>
    %150 = arith.index_cast %c3_i32 : i32 to index
    %c0_48 = arith.constant 0 : index
    %c0_49 = arith.constant 0 : index
    %151 = vector.load %arg8[%150, %c0_48, %c0_49] : memref<8x8x128xf32, #tpu.memory_space<vmem>>, vector<1x8x128xf32>
    %152 = vector.shape_cast %151 : vector<1x8x128xf32> to vector<8x128xf32>
    %153 = vector.shape_cast %149 : vector<8x128xf32> to vector<1x8x128xf32>
    tpu.vector_store %arg8[%150, %c0_48, %c0_49], %153 {strides = array<i32>} : memref<8x8x128xf32, #tpu.memory_space<vmem>>, vector<1x8x128xf32>,
    %c4_i32 = arith.constant 4 : i32
    %154 = arith.index_cast %c4_i32 : i32 to index
    %c0_50 = arith.constant 0 : index
    %c0_51 = arith.constant 0 : index
    %155 = vector.load %arg9[%154, %c0_50, %c0_51] : memref<8x8x512xf32, #tpu.memory_space<vmem>>, vector<1x8x512xf32>
    %156 = vector.shape_cast %155 : vector<1x8x512xf32> to vector<8x512xf32>
    %cst_52 = arith.constant dense<0.000000e+00> : vector<8x512xf32>
    %157 = tpu.matmul %149, %6, %cst_52 {dimension_numbers = #tpu.dot_dimension_numbers<[1], [0], [0], [1], [0, 0, 1, 1], [], []>} : vector<8x128xf32>, vector<128x512xf32>, vector<8x512xf32> -> vector<8x512xf32>
    %158 = arith.addf %156, %157 : vector<8x512xf32>
    %159 = vector.extract_strided_slice %158 {offsets = [0, 0], sizes = [8, 128], strides = [1, 1]} : vector<8x512xf32> to vector<8x128xf32>
    %160 = arith.negf %159 : vector<8x128xf32>
    %161 = math.exp %160 : vector<8x128xf32>
    %cst_53 = arith.constant 1.000000e+00 : f32
    %162 = vector.broadcast %cst_53 : f32 to vector<8x128xf32>
    %163 = arith.addf %162, %161 : vector<8x128xf32>
    %164 = arith.divf %162, %163 : vector<8x128xf32>
    %165 = vector.extract_strided_slice %158 {offsets = [0, 128], sizes = [8, 128], strides = [1, 1]} : vector<8x512xf32> to vector<8x128xf32>
    %166 = arith.negf %165 : vector<8x128xf32>
    %167 = math.exp %166 : vector<8x128xf32>
    %cst_54 = arith.constant 1.000000e+00 : f32
    %168 = vector.broadcast %cst_54 : f32 to vector<8x128xf32>
    %169 = arith.addf %168, %167 : vector<8x128xf32>
    %170 = arith.divf %168, %169 : vector<8x128xf32>
    %171 = vector.extract_strided_slice %158 {offsets = [0, 256], sizes = [8, 128], strides = [1, 1]} : vector<8x512xf32> to vector<8x128xf32>
    %172 = math.tanh %171 : vector<8x128xf32>
    %173 = vector.extract_strided_slice %158 {offsets = [0, 384], sizes = [8, 128], strides = [1, 1]} : vector<8x512xf32> to vector<8x128xf32>
    %174 = arith.negf %173 : vector<8x128xf32>
    %175 = math.exp %174 : vector<8x128xf32>
    %cst_55 = arith.constant 1.000000e+00 : f32
    %176 = vector.broadcast %cst_55 : f32 to vector<8x128xf32>
    %177 = arith.addf %176, %175 : vector<8x128xf32>
    %178 = arith.divf %176, %177 : vector<8x128xf32>
    %179 = arith.mulf %170, %147 : vector<8x128xf32>
    %180 = arith.mulf %164, %172 : vector<8x128xf32>
    %181 = arith.addf %179, %180 : vector<8x128xf32>
    %182 = math.tanh %181 : vector<8x128xf32>
    %183 = arith.mulf %178, %182 : vector<8x128xf32>
    %184 = arith.index_cast %c4_i32 : i32 to index
    %c0_56 = arith.constant 0 : index
    %c0_57 = arith.constant 0 : index
    %185 = vector.load %arg8[%184, %c0_56, %c0_57] : memref<8x8x128xf32, #tpu.memory_space<vmem>>, vector<1x8x128xf32>
    %186 = vector.shape_cast %185 : vector<1x8x128xf32> to vector<8x128xf32>
    %187 = vector.shape_cast %183 : vector<8x128xf32> to vector<1x8x128xf32>
    tpu.vector_store %arg8[%184, %c0_56, %c0_57], %187 {strides = array<i32>} : memref<8x8x128xf32, #tpu.memory_space<vmem>>, vector<1x8x128xf32>,
    %c5_i32 = arith.constant 5 : i32
    %188 = arith.index_cast %c5_i32 : i32 to index
    %c0_58 = arith.constant 0 : index
    %c0_59 = arith.constant 0 : index
    %189 = vector.load %arg9[%188, %c0_58, %c0_59] : memref<8x8x512xf32, #tpu.memory_space<vmem>>, vector<1x8x512xf32>
    %190 = vector.shape_cast %189 : vector<1x8x512xf32> to vector<8x512xf32>
    %cst_60 = arith.constant dense<0.000000e+00> : vector<8x512xf32>
    %191 = tpu.matmul %183, %6, %cst_60 {dimension_numbers = #tpu.dot_dimension_numbers<[1], [0], [0], [1], [0, 0, 1, 1], [], []>} : vector<8x128xf32>, vector<128x512xf32>, vector<8x512xf32> -> vector<8x512xf32>
    %192 = arith.addf %190, %191 : vector<8x512xf32>
    %193 = vector.extract_strided_slice %192 {offsets = [0, 0], sizes = [8, 128], strides = [1, 1]} : vector<8x512xf32> to vector<8x128xf32>
    %194 = arith.negf %193 : vector<8x128xf32>
    %195 = math.exp %194 : vector<8x128xf32>
    %cst_61 = arith.constant 1.000000e+00 : f32
    %196 = vector.broadcast %cst_61 : f32 to vector<8x128xf32>
    %197 = arith.addf %196, %195 : vector<8x128xf32>
    %198 = arith.divf %196, %197 : vector<8x128xf32>
    %199 = vector.extract_strided_slice %192 {offsets = [0, 128], sizes = [8, 128], strides = [1, 1]} : vector<8x512xf32> to vector<8x128xf32>
    %200 = arith.negf %199 : vector<8x128xf32>
    %201 = math.exp %200 : vector<8x128xf32>
    %cst_62 = arith.constant 1.000000e+00 : f32
    %202 = vector.broadcast %cst_62 : f32 to vector<8x128xf32>
    %203 = arith.addf %202, %201 : vector<8x128xf32>
    %204 = arith.divf %202, %203 : vector<8x128xf32>
    %205 = vector.extract_strided_slice %192 {offsets = [0, 256], sizes = [8, 128], strides = [1, 1]} : vector<8x512xf32> to vector<8x128xf32>
    %206 = math.tanh %205 : vector<8x128xf32>
    %207 = vector.extract_strided_slice %192 {offsets = [0, 384], sizes = [8, 128], strides = [1, 1]} : vector<8x512xf32> to vector<8x128xf32>
    %208 = arith.negf %207 : vector<8x128xf32>
    %209 = math.exp %208 : vector<8x128xf32>
    %cst_63 = arith.constant 1.000000e+00 : f32
    %210 = vector.broadcast %cst_63 : f32 to vector<8x128xf32>
    %211 = arith.addf %210, %209 : vector<8x128xf32>
    %212 = arith.divf %210, %211 : vector<8x128xf32>
    %213 = arith.mulf %204, %181 : vector<8x128xf32>
    %214 = arith.mulf %198, %206 : vector<8x128xf32>
    %215 = arith.addf %213, %214 : vector<8x128xf32>
    %216 = math.tanh %215 : vector<8x128xf32>
    %217 = arith.mulf %212, %216 : vector<8x128xf32>
    %218 = arith.index_cast %c5_i32 : i32 to index
    %c0_64 = arith.constant 0 : index
    %c0_65 = arith.constant 0 : index
    %219 = vector.load %arg8[%218, %c0_64, %c0_65] : memref<8x8x128xf32, #tpu.memory_space<vmem>>, vector<1x8x128xf32>
    %220 = vector.shape_cast %219 : vector<1x8x128xf32> to vector<8x128xf32>
    %221 = vector.shape_cast %217 : vector<8x128xf32> to vector<1x8x128xf32>
    tpu.vector_store %arg8[%218, %c0_64, %c0_65], %221 {strides = array<i32>} : memref<8x8x128xf32, #tpu.memory_space<vmem>>, vector<1x8x128xf32>,
    %c6_i32 = arith.constant 6 : i32
    %222 = arith.index_cast %c6_i32 : i32 to index
    %c0_66 = arith.constant 0 : index
    %c0_67 = arith.constant 0 : index
    %223 = vector.load %arg9[%222, %c0_66, %c0_67] : memref<8x8x512xf32, #tpu.memory_space<vmem>>, vector<1x8x512xf32>
    %224 = vector.shape_cast %223 : vector<1x8x512xf32> to vector<8x512xf32>
    %cst_68 = arith.constant dense<0.000000e+00> : vector<8x512xf32>
    %225 = tpu.matmul %217, %6, %cst_68 {dimension_numbers = #tpu.dot_dimension_numbers<[1], [0], [0], [1], [0, 0, 1, 1], [], []>} : vector<8x128xf32>, vector<128x512xf32>, vector<8x512xf32> -> vector<8x512xf32>
    %226 = arith.addf %224, %225 : vector<8x512xf32>
    %227 = vector.extract_strided_slice %226 {offsets = [0, 0], sizes = [8, 128], strides = [1, 1]} : vector<8x512xf32> to vector<8x128xf32>
    %228 = arith.negf %227 : vector<8x128xf32>
    %229 = math.exp %228 : vector<8x128xf32>
    %cst_69 = arith.constant 1.000000e+00 : f32
    %230 = vector.broadcast %cst_69 : f32 to vector<8x128xf32>
    %231 = arith.addf %230, %229 : vector<8x128xf32>
    %232 = arith.divf %230, %231 : vector<8x128xf32>
    %233 = vector.extract_strided_slice %226 {offsets = [0, 128], sizes = [8, 128], strides = [1, 1]} : vector<8x512xf32> to vector<8x128xf32>
    %234 = arith.negf %233 : vector<8x128xf32>
    %235 = math.exp %234 : vector<8x128xf32>
    %cst_70 = arith.constant 1.000000e+00 : f32
    %236 = vector.broadcast %cst_70 : f32 to vector<8x128xf32>
    %237 = arith.addf %236, %235 : vector<8x128xf32>
    %238 = arith.divf %236, %237 : vector<8x128xf32>
    %239 = vector.extract_strided_slice %226 {offsets = [0, 256], sizes = [8, 128], strides = [1, 1]} : vector<8x512xf32> to vector<8x128xf32>
    %240 = math.tanh %239 : vector<8x128xf32>
    %241 = vector.extract_strided_slice %226 {offsets = [0, 384], sizes = [8, 128], strides = [1, 1]} : vector<8x512xf32> to vector<8x128xf32>
    %242 = arith.negf %241 : vector<8x128xf32>
    %243 = math.exp %242 : vector<8x128xf32>
    %cst_71 = arith.constant 1.000000e+00 : f32
    %244 = vector.broadcast %cst_71 : f32 to vector<8x128xf32>
    %245 = arith.addf %244, %243 : vector<8x128xf32>
    %246 = arith.divf %244, %245 : vector<8x128xf32>
    %247 = arith.mulf %238, %215 : vector<8x128xf32>
    %248 = arith.mulf %232, %240 : vector<8x128xf32>
    %249 = arith.addf %247, %248 : vector<8x128xf32>
    %250 = math.tanh %249 : vector<8x128xf32>
    %251 = arith.mulf %246, %250 : vector<8x128xf32>
    %252 = arith.index_cast %c6_i32 : i32 to index
    %c0_72 = arith.constant 0 : index
    %c0_73 = arith.constant 0 : index
    %253 = vector.load %arg8[%252, %c0_72, %c0_73] : memref<8x8x128xf32, #tpu.memory_space<vmem>>, vector<1x8x128xf32>
    %254 = vector.shape_cast %253 : vector<1x8x128xf32> to vector<8x128xf32>
    %255 = vector.shape_cast %251 : vector<8x128xf32> to vector<1x8x128xf32>
    tpu.vector_store %arg8[%252, %c0_72, %c0_73], %255 {strides = array<i32>} : memref<8x8x128xf32, #tpu.memory_space<vmem>>, vector<1x8x128xf32>,
    %c7_i32 = arith.constant 7 : i32
    %256 = arith.index_cast %c7_i32 : i32 to index
    %c0_74 = arith.constant 0 : index
    %c0_75 = arith.constant 0 : index
    %257 = vector.load %arg9[%256, %c0_74, %c0_75] : memref<8x8x512xf32, #tpu.memory_space<vmem>>, vector<1x8x512xf32>
    %258 = vector.shape_cast %257 : vector<1x8x512xf32> to vector<8x512xf32>
    %cst_76 = arith.constant dense<0.000000e+00> : vector<8x512xf32>
    %259 = tpu.matmul %251, %6, %cst_76 {dimension_numbers = #tpu.dot_dimension_numbers<[1], [0], [0], [1], [0, 0, 1, 1], [], []>} : vector<8x128xf32>, vector<128x512xf32>, vector<8x512xf32> -> vector<8x512xf32>
    %260 = arith.addf %258, %259 : vector<8x512xf32>
    %261 = vector.extract_strided_slice %260 {offsets = [0, 0], sizes = [8, 128], strides = [1, 1]} : vector<8x512xf32> to vector<8x128xf32>
    %262 = arith.negf %261 : vector<8x128xf32>
    %263 = math.exp %262 : vector<8x128xf32>
    %cst_77 = arith.constant 1.000000e+00 : f32
    %264 = vector.broadcast %cst_77 : f32 to vector<8x128xf32>
    %265 = arith.addf %264, %263 : vector<8x128xf32>
    %266 = arith.divf %264, %265 : vector<8x128xf32>
    %267 = vector.extract_strided_slice %260 {offsets = [0, 128], sizes = [8, 128], strides = [1, 1]} : vector<8x512xf32> to vector<8x128xf32>
    %268 = arith.negf %267 : vector<8x128xf32>
    %269 = math.exp %268 : vector<8x128xf32>
    %cst_78 = arith.constant 1.000000e+00 : f32
    %270 = vector.broadcast %cst_78 : f32 to vector<8x128xf32>
    %271 = arith.addf %270, %269 : vector<8x128xf32>
    %272 = arith.divf %270, %271 : vector<8x128xf32>
    %273 = vector.extract_strided_slice %260 {offsets = [0, 256], sizes = [8, 128], strides = [1, 1]} : vector<8x512xf32> to vector<8x128xf32>
    %274 = math.tanh %273 : vector<8x128xf32>
    %275 = vector.extract_strided_slice %260 {offsets = [0, 384], sizes = [8, 128], strides = [1, 1]} : vector<8x512xf32> to vector<8x128xf32>
    %276 = arith.negf %275 : vector<8x128xf32>
    %277 = math.exp %276 : vector<8x128xf32>
    %cst_79 = arith.constant 1.000000e+00 : f32
    %278 = vector.broadcast %cst_79 : f32 to vector<8x128xf32>
    %279 = arith.addf %278, %277 : vector<8x128xf32>
    %280 = arith.divf %278, %279 : vector<8x128xf32>
    %281 = arith.mulf %272, %249 : vector<8x128xf32>
    %282 = arith.mulf %266, %274 : vector<8x128xf32>
    %283 = arith.addf %281, %282 : vector<8x128xf32>
    %284 = math.tanh %283 : vector<8x128xf32>
    %285 = arith.mulf %280, %284 : vector<8x128xf32>
    %286 = arith.index_cast %c7_i32 : i32 to index
    %c0_80 = arith.constant 0 : index
    %c0_81 = arith.constant 0 : index
    %287 = vector.load %arg8[%286, %c0_80, %c0_81] : memref<8x8x128xf32, #tpu.memory_space<vmem>>, vector<1x8x128xf32>
    %288 = vector.shape_cast %287 : vector<1x8x128xf32> to vector<8x128xf32>
    %289 = vector.shape_cast %285 : vector<8x128xf32> to vector<1x8x128xf32>
    tpu.vector_store %arg8[%286, %c0_80, %c0_81], %289 {strides = array<i32>} : memref<8x8x128xf32, #tpu.memory_space<vmem>>, vector<1x8x128xf32>,
    %c8_i32 = arith.constant 8 : i32
    %c0_82 = arith.constant 0 : index
    %c0_83 = arith.constant 0 : index
    %c0_84 = arith.constant 0 : index
    %290 = vector.load %arg6[%c0_82, %c0_83, %c0_84] : memref<1x8x128xf32, #tpu.memory_space<vmem>>, vector<1x8x128xf32>
    %291 = vector.shape_cast %290 : vector<1x8x128xf32> to vector<8x128xf32>
    %292 = vector.shape_cast %285 : vector<8x128xf32> to vector<1x8x128xf32>
    tpu.vector_store %arg6[%c0_82, %c0_83, %c0_84], %292 {strides = array<i32>} : memref<1x8x128xf32, #tpu.memory_space<vmem>>, vector<1x8x128xf32>,
    %c0_85 = arith.constant 0 : index
    %c0_86 = arith.constant 0 : index
    %c0_87 = arith.constant 0 : index
    %293 = vector.load %arg7[%c0_85, %c0_86, %c0_87] : memref<1x8x128xf32, #tpu.memory_space<vmem>>, vector<1x8x128xf32>
    %294 = vector.shape_cast %293 : vector<1x8x128xf32> to vector<8x128xf32>
    %295 = vector.shape_cast %283 : vector<8x128xf32> to vector<1x8x128xf32>
    tpu.vector_store %arg7[%c0_85, %c0_86, %c0_87], %295 {strides = array<i32>} : memref<1x8x128xf32, #tpu.memory_space<vmem>>, vector<1x8x128xf32>,
    %c1_i32_88 = arith.constant 1 : i32
    %296 = arith.cmpi eq, %arg0, %c1_i32_88 : i32
    %297 = arith.extui %296 : i1 to i32
    %c0_i32_89 = arith.constant 0 : i32
    %298 = arith.cmpi ne, %297, %c0_i32_89 : i32
    scf.if %298 {
      %c0_90 = arith.constant 0 : index
      %c0_91 = arith.constant 0 : index
      %c0_92 = arith.constant 0 : index
      %299 = vector.load %arg8[%c0_90, %c0_91, %c0_92] : memref<8x8x128xf32, #tpu.memory_space<vmem>>, vector<8x8x128xf32>
      %c0_93 = arith.constant 0 : index
      %c0_94 = arith.constant 0 : index
      %c0_95 = arith.constant 0 : index
      %300 = vector.load %arg5[%c0_93, %c0_94, %c0_95] : memref<8x8x128xf32, #tpu.memory_space<vmem>>, vector<8x8x128xf32>
      tpu.vector_store %arg5[%c0_93, %c0_94, %c0_95], %299 {strides = array<i32>} : memref<8x8x128xf32, #tpu.memory_space<vmem>>, vector<8x8x128xf32>,
    } else {
    }
    return
  }
  func.func @transform_0(%arg0: i32) -> (i32, i32, i32) {
    %c0_i32 = arith.constant 0 : i32
    %c0_i32_0 = arith.constant 0 : i32
    %c0_i32_1 = arith.constant 0 : i32
    %c0_i32_2 = arith.constant 0 : i32
    return %c0_i32, %c0_i32_0, %c0_i32_1 : i32, i32, i32
  }
  func.func @transform_1(%arg0: i32) -> (i32, i32, i32) {
    %c0_i32 = arith.constant 0 : i32
    %c0_i32_0 = arith.constant 0 : i32
    %c0_i32_1 = arith.constant 0 : i32
    return %arg0, %c0_i32, %c0_i32_0 : i32, i32, i32
  }
  func.func @transform_2(%arg0: i32) -> (i32, i32, i32) {
    %c0_i32 = arith.constant 0 : i32
    %c0_i32_0 = arith.constant 0 : i32
    %c0_i32_1 = arith.constant 0 : i32
    return %arg0, %c0_i32, %c0_i32_0 : i32, i32, i32
  }
  func.func @transform_3(%arg0: i32) -> (i32, i32, i32) {
    %c0_i32 = arith.constant 0 : i32
    %c0_i32_0 = arith.constant 0 : i32
    %c0_i32_1 = arith.constant 0 : i32
    return %arg0, %c0_i32, %c0_i32_0 : i32, i32, i32
  }
  func.func @transform_4(%arg0: i32) -> (i32, i32, i32) {
    %c0_i32 = arith.constant 0 : i32
    %c0_i32_0 = arith.constant 0 : i32
    %c0_i32_1 = arith.constant 0 : i32
    %c0_i32_2 = arith.constant 0 : i32
    return %c0_i32, %c0_i32_0, %c0_i32_1 : i32, i32, i32
  }
  func.func @transform_5(%arg0: i32) -> (i32, i32, i32) {
    %c0_i32 = arith.constant 0 : i32
    %c0_i32_0 = arith.constant 0 : i32
    %c0_i32_1 = arith.constant 0 : i32
    return %arg0, %c0_i32, %c0_i32_0 : i32, i32, i32
  }
  func.func @transform_6(%arg0: i32) -> (i32, i32, i32) {
    %c0_i32 = arith.constant 0 : i32
    %c0_i32_0 = arith.constant 0 : i32
    %c0_i32_1 = arith.constant 0 : i32
    return %arg0, %c0_i32, %c0_i32_0 : i32, i32, i32
  }
}

</mosaic_0001>

<bundles_post_ra>
// kernel: tpu_custom_call.1
= control target key start
LH: loop header
LB: loop body
LE: loop exit
PB: predicated region body
PF: predicated region fallthrough
CT: control target
= control target key end

     0   :  { %s4463_s0 = inlined_call_operand.hbm [shape: f32[8,8,128], index: 0, kind: input, shape index: {}]   ;;  %s4464_s1 = inlined_call_operand.hbm [shape: f32[2,128,512], index: 1, kind: input, shape index: {}]   ;;  %s4465_s2 = inlined_call_operand.hbm [shape: f32[2,128,512], index: 2, kind: input, shape index: {}]   ;;  %s4466_s3 = inlined_call_operand.vmem [shape: f32[2,1,512], index: 3, kind: input, shape index: {}]   ;;  %s4467_s4 = inlined_call_operand.hbm [shape: f32[8,8,128], index: 4, kind: output, shape index: {0}]   ;;  %s4468_s5 = inlined_call_operand.hbm [shape: f32[2,8,128], index: 5, kind: output, shape index: {1}]   ;;  %s4469_s6 = inlined_call_operand.hbm [shape: f32[2,8,128], index: 6, kind: output, shape index: {2}]  }
   0x1   :  { %4476 = sst [smem:[#allocation18_spill]] %s4463_s0 }
   0x2   :  { %12 = vsyncpa [#allocation5], 0 }
   0x3   :  { %13 = vsyncpa [#allocation8], 0 }
   0x4   :  { %15 = vsyncpa [#allocation8 + $0x1], 0 }
   0x5   :  { %16 = vsyncpa [#allocation6], 0 }
   0x6   :  { %17 = vsyncpa [#allocation12], 0 }
   0x7   :  { %19 = vsyncpa [#allocation12 + $0x1], 0  ;;  %s3586_s21 = smov 0   ;;  %s3588_s22 = smov 0  }
   0x8   :  { %s3590_s23 = smov 0   ;;  %s3592_s24 = smov 0  }
   0x9 LB: > { %s3607_s25 = sadd.s32 1, %s3536_s24   ;;  %s53_s26 = sadd.s32 1, %s3532_s23  ;;  %s3536_s24 = sphi %s3592_s24, %s4503_s24   ;;  %s3532_s23 = sphi %s3590_s23, %s4502_s23   ;;  %s3528_s22 = sphi %s3588_s22, %s4501_s22   ;;  %s3524_s21 = sphi %s3586_s21, %s4500_s21  }
   0xa   : > { %s50_s27 = ssub.s32 %s3536_s24, %s3607_s25  ;;  %p60_p0 = scmp.ne.s32.totalorder %s3532_s23, %s3528_s22 }
   0xb   : > { %p51_p1 = scmp.eq.s32.totalorder %s50_s27, 0  ;;  %p61_p2 = scmp.eq.s32.totalorder %s3536_s24, 0 }
   0xc   : > { %p3146_p4 = scmp.lt.s32.totalorder %s3536_s24, 2  ;;  %s228_s29 = sand.u32 1, %s3536_s24  }
   0xd   : > { %s3618_s28 = scalar_select %p51_p1, %s3532_s23, %s53_s26  }
   0xe   : > { %p62_p5 = por %p61_p2, %p60_p0  ;;  %s230_s30 = sand.u32 1, %s3532_s23  }
   0xf   : > { %s3625_s7 = sshll.u32 %s230_s30, 9  ;;  %s2469_s8 = sshll.u32 %s3536_s24, 13 }
  0x10   : > { %s3633_s11 = scalar_lea.hbm %s4464_s1, %s2469_s8  ;;  %s232_s12 = scalar_lea.vmem [#allocation7], %s3625_s7 }
  0x11   : > { %s239_s13 = sshll.u32 %s232_s12, 4  ;;  %p3636_p6 = pnand %p3146_p4, %p62_p5  ;;  %s3640_s13 = int_to_ptr.vmem [resolvable:$true] %s239_s13 }
  0x12   : > { %s3642_s15 = scalar_lea.sflag [#allocation8], %s228_s29  ;;  %s3320_s16 = scalar_lea.hbm %s3633_s11, 8192 }
  0x13   : > { %p3321_p7 = scmp.ne.s32.totalorder %s3633_s11, %s3320_s16  ;;  %p3322_p8 = pneg %p3636_p6 }
  0x14   : > { %s3325_s19 = scalar_lea.hbm %s4464_s1, 16384  ;;  %p3326_p11 = scmp.lt.u32.totalorder %s3633_s11, %s4464_s1 }
  0x15   : > { %p3323_p9 = pnand %p3322_p8, %p3321_p7  ;;  %p3327_p12 = scmp.lt.u32.totalorder %s3325_s19, %s3320_s16 }
  0x16   : > { %p3329_p1 = scmp.lt.u32.totalorder %s3320_s16, %s3633_s11 }
  0x17   : > { %p3324_p10 = pneg %p3323_p9  ;;  %p3328_p13 = por %p3327_p12, %p3326_p11 }
  0x19   : > { %p3330_p2 = por %p3329_p1, %p3328_p13 }
  0x1b   : > { %p3331_p4 = pnand %p3330_p2, %p3324_p10 }
  0x1d   : > { %3334 = shalt.err (!%p3331_p4)
}
  0x1e   : > { %s3335_s27 = scalar_lea.vmem %s3640_s13, 8192  ;;  %s3538_s29 = smov [#allocation7]  }
  0x1f   : > { %p3336_p5 = scmp.ne.s32.totalorder %s3640_s13, %s3335_s27  ;;  %s3340_s30 = sshll.u32 %s3538_s29, 4  ;;  %s3341_s30 = int_to_ptr.vmem [resolvable:$false] %s3340_s30 }
  0x20   : > { %s3342_s9 = scalar_lea.vmem %s3341_s30, 16384  ;;  %p3343_p3 = scmp.lt.s32.totalorder %s3640_s13, %s3341_s30 }
  0x21   : > { %p3338_p7 = pnand %p3336_p5, %p3322_p8  ;;  %p3344_p11 = scmp.lt.s32.totalorder %s3342_s9, %s3335_s27 }
  0x23   : > { %p3339_p9 = pneg %p3338_p7  ;;  %p3345_p12 = por %p3344_p11, %p3343_p3 }
  0x25   : > { %p3346_p13 = pnand %p3345_p12, %p3339_p9 }
  0x27   : > { %3349 = shalt.err (!%p3346_p13)
}
  0x28   : > { %s3539_s10 = smov 512   ;;  %s3540_s12 = smov 32  }
  0x29   : > { %3134 = dma.hbm_to_vmem [thread:$0]  (!%p3636_p6), %s3633_s11, 8192, %s3640_s13, %s3642_s15, %s3539_s10, %s3539_s10, %s3540_s12  }
  0x2a   : > { %s3678_s18 = scalar_lea.hbm %s4465_s2, %s2469_s8  ;;  %s253_s19 = scalar_lea.vmem [#allocation9], %s3625_s7 }
  0x2b   : > { %s260_s20 = sshll.u32 %s253_s19, 4  ;;  %s3682_s26 = sadd.s32 4294967295, %s3536_s24   ;;  %s3713_s20 = int_to_ptr.vmem [resolvable:$true] %s260_s20 }
  0x2c   : > { %s4471_s27 = sadd.s32 4294967294, %s3536_s24   ;;  %p66_p3 = scmp.ne.s32.totalorder %s3528_s22, %s3524_s21 }
  0x2d   : > { %p4472_p10 = scmp.eq.s32.totalorder %s3682_s26, 0  ;;  %p4470_p1 = scmp.eq.s32.totalorder %s3682_s26, 1 }
  0x2e   : > { %p169_p2 = scmp.eq.s32.totalorder %s4471_s27, 1  ;;  %p2419_p5 = scmp.ge.s32.totalorder %s3536_s24, 1 }
  0x2f   : > { %p3693_p4 = por %p4472_p10, %p66_p3  ;;  %p3703_p7 = por %p4470_p1, %p60_p0 }
  0x30   : > { %p3707_p9 = por %p169_p2, %p66_p3  ;;  %p202_p11 = scmp.lt.s32.totalorder %s3536_s24, 3 }
  0x31   : > { %s4478_s7 = scalar_select %p3693_p4, 1, 0 }
  0x32   : > { %s4479_s8 = scalar_select %p3703_p7, 1, 0 }
  0x33   : > { %s4480_s21 = scalar_select %p3707_p9, 1, 0 }
  0x34   : > { %p3715_p13 = pnand %p2419_p5, %p202_p11  ;;  %s3541_s13 = smov [#allocation4]  }
  0x35   : > { %s214_s29 = sshll.u32 %s3541_s13, 4  ;;  %s3350_s30 = scalar_lea.hbm %s3678_s18, 8192  ;;  %s3721_s29 = int_to_ptr.vmem [resolvable:$true] %s214_s29 }
  0x36   : > { %s4481_s11 = scalar_select %p3715_p13, 1, 0 }
  0x37   : > { %p3351_p3 = scmp.ne.s32.totalorder %s3678_s18, %s3350_s30  ;;  %s3355_s17 = scalar_lea.hbm %s4465_s2, 16384 }
  0x38   : > { %p3356_p5 = scmp.lt.u32.totalorder %s3678_s18, %s4465_s2  ;;  %p3357_p11 = scmp.lt.u32.totalorder %s3355_s17, %s3350_s30 }
  0x39   : > { %p3353_p2 = pnand %p3351_p3, %p3322_p8  ;;  %p3359_p10 = scmp.lt.u32.totalorder %s3350_s30, %s3678_s18 }
  0x3a   : > { %p3358_p12 = por %p3357_p11, %p3356_p5 }
  0x3b   : > { %p3354_p1 = pneg %p3353_p2 }
  0x3c   : > { %p3360_p0 = por %p3359_p10, %p3358_p12 }
  0x3e   : > { %p3361_p9 = pnand %p3360_p0, %p3354_p1 }
  0x40   : > { %3364 = shalt.err (!%p3361_p9)
}
  0x41   : > { %s3365_s13 = scalar_lea.vmem %s3713_s20, 8192  ;;  %s3542_s9 = smov [#allocation9]  }
  0x42   : > { %p3366_p3 = scmp.ne.s32.totalorder %s3713_s20, %s3365_s13  ;;  %s3370_s16 = sshll.u32 %s3542_s9, 4  ;;  %s3371_s16 = int_to_ptr.vmem [resolvable:$false] %s3370_s16 }
  0x43   : > { %s3372_s27 = scalar_lea.vmem %s3371_s16, 16384  ;;  %p3373_p4 = scmp.lt.s32.totalorder %s3713_s20, %s3371_s16 }
  0x44   : > { %p3368_p2 = pnand %p3366_p3, %p3322_p8  ;;  %p3374_p5 = scmp.lt.s32.totalorder %s3372_s27, %s3365_s13 }
  0x46   : > { %p3369_p7 = pneg %p3368_p2  ;;  %p3375_p11 = por %p3374_p5, %p3373_p4 }
  0x48   : > { %p3376_p10 = pnand %p3375_p11, %p3369_p7 }
  0x4a   : > { %3379 = shalt.err (!%p3376_p10)
}
  0x4b   : > { %3137 = dma.hbm_to_vmem [thread:$0]  (!%p3636_p6), %s3678_s18, 8192, %s3713_s20, %s3642_s15, %s3539_s10, %s3539_s10, %s3540_s12  }
  0x4c   : > { %p4482_p8 = scmp.eq.s32.totalorder %s3682_s26, 0  ;;  %p4483_p1 = pneg %p3715_p13 }
  0x4d   : > { %s4485_s0 = sld [smem:[#allocation18_spill]] }
  0x4e   : > { %p3755_p9 = pnand %p4483_p1, %p4482_p8 }
  0x50   : > { %p3382_p7 = pneg %p3755_p9 }
  0x53   : > { %s3380_s14 = scalar_lea.hbm %s4485_s0, 1024 }
  0x54   : > { %p3381_p4 = scmp.ne.s32.totalorder %s4485_s0, %s3380_s14  ;;  %p3387_p0 = scmp.lt.u32.totalorder %s3380_s14, %s4485_s0 }
  0x56   : > { %p3383_p12 = pnand %p3382_p7, %p3381_p4 }
  0x58   : > { %p3384_p6 = pneg %p3383_p12 }
  0x5a   : > { %p3389_p3 = pnand %p3387_p0, %p3384_p6 }
  0x5c   : > { %3392 = shalt.err (!%p3389_p3)
}
  0x5d   : > { %s3393_s12 = scalar_lea.vmem %s3721_s29, 1024  ;;  %p3401_p10 = scmp.lt.s32.totalorder %s3721_s29, %s3721_s29 }
  0x5e   : > { %p3394_p2 = scmp.ne.s32.totalorder %s3721_s29, %s3393_s12  ;;  %p3402_p8 = scmp.lt.s32.totalorder %s3393_s12, %s3393_s12 }
  0x60   : > { %p3396_p5 = pnand %p3394_p2, %p3382_p7  ;;  %p3403_p1 = por %p3402_p8, %p3401_p10 }
  0x62   : > { %p3397_p11 = pneg %p3396_p5 }
  0x64   : > { %p3404_p13 = pnand %p3403_p1, %p3397_p11 }
  0x66   : > { %3407 = shalt.err (!%p3404_p13)
}
  0x67   : > { %s3543_s18 = smov 128   ;;  %s3544_s20 = smov 8  }
  0x68   : > { %3130 = dma.hbm_to_vmem [thread:$0]  (!%p3755_p9), %s4485_s0, 1024, %s3721_s29, [#allocation5], %s3543_s18, %s3543_s18, %s3544_s20  }
  0x69   : > { %p4486_p4 = scmp.ne.s32.totalorder %s4481_s11, 0 }
  0x6a   : > { %p4487_p7 = scmp.eq.s32.totalorder (!%p4486_p4), %s3682_s26, 0 }
  0x6b   : > { %279 = sbr.rel (%p4486_p4) target bundleno = 2351 (0x92f), region = 36 }
  0x72   : > { %3507 = dma.done.wait (%p4487_p7), [#allocation5], 1024   ;;  %p4488_p12 = pmov %p4487_p7 }
  0x73   : > { %s285_s17 = sand.u32 1, %s3682_s26   ;;  %s287_s19 = sand.u32 1, %s3528_s22  }
  0x74   : > { %3509 = vsyncadd (%p4488_p12), [#allocation5], 4294966272  ;;  %s2430_s30 = sshll.u32 %s287_s19, 9  ;;  %s286_s14 = scalar_lea.sflag [#allocation8], %s285_s17 }
  0x75   : > { %s3790_s13 = scalar_lea.vmem [#allocation7], %s2430_s30  ;;  %p4489_p13 = scmp.ne.s32.totalorder %s4478_s7, 0 }
  0x77   : > { %3511 = dma.done.wait (%p4489_p13), %s286_s14, 16384  }
  0x78   : > { %3513 = vsyncadd (%p4489_p13), %s286_s14, 4294950912  ;;  %s3796_s11 = sshll.u32 %s287_s19, 3  ;;  %p341_p9 = scmp.lt.s32.totalorder %s3682_s26, 1 }
  0x79   : > { %s3805_s18 = scalar_lea.vmem [#allocation9], %s2430_s30  ;;  %s333_s20 = scalar_lea.vmem [#allocation11], %s3796_s11 }
  0x7a   : > { %s342_s29 = scalar_select %p341_p9, %s3682_s26, 1 }
  0x7b   : > { %s340_s16 = scalar_lea.vmem [#allocation13], %s3796_s11  ;;  %p4490_p6 = scmp.ne.s32.totalorder %s3682_s26, 0 }
  0x7c   : > { %s2434_s9 = sshll.u32 %s342_s29, 2  ;;  %v349_v0 = vld [vmem:[#allocation4] sm:$0xff] (!%p4490_p6)  ;;  %v350_v1 = vld [vmem:[#allocation4 + $0x8] sm:$0xff] (!%p4490_p6)  ;;  %v351_v2 = vld [vmem:[#allocation4 + $0x10] sm:$0xff] (!%p4490_p6) }
  0x7d   : > { %s3803_s12 = scalar_lea.vmem %s4466_s3, %s2434_s9  ;;  %348 = sbr.rel (%p4490_p6) target bundleno = 132 (0x84), region = 52  ;;  %357 = vst [vmem:[#allocation2] sm:$0xff] (!%p4490_p6), %v349_v0  ;;  %358 = vst [vmem:[#allocation2 + $0x8] sm:$0xff] (!%p4490_p6), %v350_v1  ;;  %v352_v3 = vld [vmem:[#allocation4 + $0x18] sm:$0xff] (!%p4490_p6)  ;;  %v353_v4 = vld [vmem:[#allocation4 + $0x20] sm:$0xff] (!%p4490_p6) }
  0x7e   : > { %359 = vst [vmem:[#allocation2 + $0x10] sm:$0xff] (!%p4490_p6), %v351_v2  ;;  %v354_v5 = vld [vmem:[#allocation4 + $0x28] sm:$0xff] (!%p4490_p6)  ;;  %360 = vst [vmem:[#allocation2 + $0x18] sm:$0xff] (!%p4490_p6), %v352_v3  ;;  %v355_v6 = vld [vmem:[#allocation4 + $0x30] sm:$0xff] (!%p4490_p6) }
  0x7f   : > { %361 = vst [vmem:[#allocation2 + $0x20] sm:$0xff] (!%p4490_p6), %v353_v4  ;;  %362 = vst [vmem:[#allocation2 + $0x28] sm:$0xff] (!%p4490_p6), %v354_v5  ;;  %v356_v7 = vld [vmem:[#allocation4 + $0x38] sm:$0xff] (!%p4490_p6) }
  0x80   : > { %363 = vst [vmem:[#allocation2 + $0x30] sm:$0xff] (!%p4490_p6), %v355_v6  ;;  %364 = vst [vmem:[#allocation2 + $0x38] sm:$0xff] (!%p4490_p6), %v356_v7 }
  0x84 PF: > { %v366_v8 = vld [vmem:[%s3790_s13 + $0x8] sm:$0xff]  ;;  %v368_v10 = vld [vmem:[%s3790_s13 + $0x18] sm:$0xff]  ;;  %v365_v13 = vld [vmem:[%s3790_s13] sm:$0xff]  ;;  %v3545_v15 = vmov 0.0   ;;  %p2460_p0 = scmp.ne.s32.totalorder %s3682_s26, 1 }
  0x85   : > { %v370_v9 = vld [vmem:[%s3790_s13 + $0x28] sm:$0xff]  ;;  %v372_v12 = vld [vmem:[%s3790_s13 + $0x38] sm:$0xff]  ;;  %v369_v14 = vld [vmem:[%s3790_s13 + $0x20] sm:$0xff]  ;;  %587 = vmatprep.mubr.f32.mxu0 %v3545_v15  ;;  %700 = vmatprep.mubr.f32.mxu1 %v3545_v15 }
  0x86   : > { %v2471_v11 = vpack.c.bf16 %v370_v9, %v366_v8  ;;  %v2503_v16 = vpack.c.bf16 %v372_v12, %v368_v10  ;;  %v2473_v17 = vpack.c.bf16 %v369_v14, %v365_v13  ;;  %v367_v18 = vld [vmem:[%s3790_s13 + $0x10] sm:$0xff]  ;;  %v374_v20 = vld [vmem:[%s3790_s13 + $0x48] sm:$0xff]  ;;  %v376_v23 = vld [vmem:[%s3790_s13 + $0x58] sm:$0xff] }
  0x87   : > { %v371_v19 = vld [vmem:[%s3790_s13 + $0x30] sm:$0xff]  ;;  %v378_v22 = vld [vmem:[%s3790_s13 + $0x68] sm:$0xff]  ;;  %v380_v24 = vld [vmem:[%s3790_s13 + $0x78] sm:$0xff] }
  0x88   : > { %2472 = vmatprep.subr.bf16.mxu0 %v2471_v11  ;;  %v2505_v21 = vpack.c.bf16 %v371_v19, %v367_v18  ;;  %2504 = vmatprep.subr.bf16.mxu1 %v2503_v16  ;;  %v2475_v25 = vpack.c.bf16 %v378_v22, %v374_v20  ;;  %v2507_v26 = vpack.c.bf16 %v380_v24, %v376_v23  ;;  %v373_v27 = vld [vmem:[%s3790_s13 + $0x40] sm:$0xff]  ;;  %v375_v29 = vld [vmem:[%s3790_s13 + $0x50] sm:$0xff]  ;;  %v382_v32 = vld [vmem:[%s3790_s13 + $0x88] sm:$0xff] }
  0x89   : > { %2474 = vmatpush1.bf16.msra.mxu0 %v2473_v17  ;;  %v377_v28 = vld [vmem:[%s3790_s13 + $0x60] sm:$0xff]  ;;  %v379_v31 = vld [vmem:[%s3790_s13 + $0x70] sm:$0xff]  ;;  %v386_v33 = vld [vmem:[%s3790_s13 + $0xa8] sm:$0xff] }
  0x8a   : > { %2506 = vmatpush1.bf16.msra.mxu1 %v2505_v21  ;;  %v2477_v30 = vpack.c.bf16 %v377_v28, %v373_v27  ;;  %2476 = vmatprep.subr.bf16.mxu0 %v2475_v25  ;;  %v2509_v34 = vpack.c.bf16 %v379_v31, %v375_v29  ;;  %v2479_v35 = vpack.c.bf16 %v386_v33, %v382_v32  ;;  %v384_v36 = vld [vmem:[%s3790_s13 + $0x98] sm:$0xff]  ;;  %v381_v38 = vld [vmem:[%s3790_s13 + $0x80] sm:$0xff]  ;;  %v383_v41 = vld [vmem:[%s3790_s13 + $0x90] sm:$0xff] }
  0x8b   : > { %2508 = vmatprep.subr.bf16.mxu1 %v2507_v26  ;;  %v388_v37 = vld [vmem:[%s3790_s13 + $0xb8] sm:$0xff]  ;;  %v385_v40 = vld [vmem:[%s3790_s13 + $0xa0] sm:$0xff]  ;;  %v387_v42 = vld [vmem:[%s3790_s13 + $0xb0] sm:$0xff] }
  0x8c   : > { %v2511_v39 = vpack.c.bf16 %v388_v37, %v384_v36  ;;  %v2481_v43 = vpack.c.bf16 %v385_v40, %v381_v38  ;;  %v390_v44 = vld [vmem:[%s3790_s13 + $0xc8] sm:$0xff]  ;;  %v392_v46 = vld [vmem:[%s3790_s13 + $0xd8] sm:$0xff]  ;;  %v2513_v47 = vpack.c.bf16 %v387_v42, %v383_v41  ;;  %v389_v50 = vld [vmem:[%s3790_s13 + $0xc0] sm:$0xff] }
  0x8d   : > { %2478 = vmatpush1.bf16.msra.mxu0 %v2477_v30  ;;  %v394_v45 = vld [vmem:[%s3790_s13 + $0xe8] sm:$0xff]  ;;  %v396_v49 = vld [vmem:[%s3790_s13 + $0xf8] sm:$0xff]  ;;  %v393_v51 = vld [vmem:[%s3790_s13 + $0xe0] sm:$0xff] }
  0x8e   : > { %2510 = vmatpush1.bf16.msra.mxu1 %v2509_v34  ;;  %2480 = vmatprep.subr.bf16.mxu0 %v2479_v35  ;;  %v2483_v48 = vpack.c.bf16 %v394_v45, %v390_v44  ;;  %v2515_v52 = vpack.c.bf16 %v396_v49, %v392_v46  ;;  %v391_v53 = vld [vmem:[%s3790_s13 + $0xd0] sm:$0xff]  ;;  %v398_v55 = vld [vmem:[%s3790_s13 + $0x108] sm:$0xff]  ;;  %v400_v57 = vld [vmem:[%s3790_s13 + $0x118] sm:$0xff]  ;;  %v2485_v59 = vpack.c.bf16 %v393_v51, %v389_v50 }
  0x8f   : > { %2512 = vmatprep.subr.bf16.mxu1 %v2511_v39  ;;  %v395_v54 = vld [vmem:[%s3790_s13 + $0xf0] sm:$0xff]  ;;  %v402_v56 = vld [vmem:[%s3790_s13 + $0x128] sm:$0xff]  ;;  %v404_v58 = vld [vmem:[%s3790_s13 + $0x138] sm:$0xff] }
  0x90   : > { %v2517_v60 = vpack.c.bf16 %v395_v54, %v391_v53  ;;  %v2487_v61 = vpack.c.bf16 %v402_v56, %v398_v55  ;;  %v397_v62 = vld [vmem:[%s3790_s13 + $0x100] sm:$0xff]  ;;  %v399_v0 = vld [vmem:[%s3790_s13 + $0x110] sm:$0xff]  ;;  %v2519_v1 = vpack.c.bf16 %v404_v58, %v400_v57  ;;  %v406_v3 = vld [vmem:[%s3790_s13 + $0x148] sm:$0xff] }
  0x91   : > { %2482 = vmatpush1.bf16.msra.mxu0 %v2481_v43  ;;  %v401_v63 = vld [vmem:[%s3790_s13 + $0x120] sm:$0xff]  ;;  %v403_v2 = vld [vmem:[%s3790_s13 + $0x130] sm:$0xff]  ;;  %v410_v4 = vld [vmem:[%s3790_s13 + $0x168] sm:$0xff] }
  0x92   : > { %2514 = vmatpush1.bf16.msra.mxu1 %v2513_v47  ;;  %2484 = vmatprep.subr.bf16.mxu0 %v2483_v48  ;;  %v408_v5 = vld [vmem:[%s3790_s13 + $0x158] sm:$0xff]  ;;  %v2489_v7 = vpack.c.bf16 %v401_v63, %v397_v62  ;;  %v2521_v8 = vpack.c.bf16 %v403_v2, %v399_v0  ;;  %v2491_v9 = vpack.c.bf16 %v410_v4, %v406_v3  ;;  %v405_v10 = vld [vmem:[%s3790_s13 + $0x140] sm:$0xff]  ;;  %v407_v12 = vld [vmem:[%s3790_s13 + $0x150] sm:$0xff] }
  0x93   : > { %2516 = vmatprep.subr.bf16.mxu1 %v2515_v52  ;;  %v412_v6 = vld [vmem:[%s3790_s13 + $0x178] sm:$0xff]  ;;  %v409_v11 = vld [vmem:[%s3790_s13 + $0x160] sm:$0xff]  ;;  %v411_v14 = vld [vmem:[%s3790_s13 + $0x170] sm:$0xff] }
  0x94   : > { %v2523_v13 = vpack.c.bf16 %v412_v6, %v408_v5  ;;  %v414_v16 = vld [vmem:[%s3790_s13 + $0x188] sm:$0xff]  ;;  %v416_v18 = vld [vmem:[%s3790_s13 + $0x198] sm:$0xff]  ;;  %v2493_v20 = vpack.c.bf16 %v409_v11, %v405_v10  ;;  %v2525_v21 = vpack.c.bf16 %v411_v14, %v407_v12  ;;  %v413_v23 = vld [vmem:[%s3790_s13 + $0x180] sm:$0xff] }
  0x95   : > { %2486 = vmatpush1.bf16.msra.mxu0 %v2485_v59  ;;  %v418_v17 = vld [vmem:[%s3790_s13 + $0x1a8] sm:$0xff]  ;;  %v420_v19 = vld [vmem:[%s3790_s13 + $0x1b8] sm:$0xff]  ;;  %v417_v24 = vld [vmem:[%s3790_s13 + $0x1a0] sm:$0xff] }
  0x96   : > { %2518 = vmatpush1.bf16.msra.mxu1 %v2517_v60  ;;  %2488 = vmatprep.subr.bf16.mxu0 %v2487_v61  ;;  %v2495_v22 = vpack.c.bf16 %v418_v17, %v414_v16  ;;  %v415_v25 = vld [vmem:[%s3790_s13 + $0x190] sm:$0xff]  ;;  %v2527_v26 = vpack.c.bf16 %v420_v19, %v416_v18  ;;  %v422_v28 = vld [vmem:[%s3790_s13 + $0x1c8] sm:$0xff]  ;;  %v424_v30 = vld [vmem:[%s3790_s13 + $0x1d8] sm:$0xff]  ;;  %v2497_v32 = vpack.c.bf16 %v417_v24, %v413_v23 }
  0x97   : > { %2520 = vmatprep.subr.bf16.mxu1 %v2519_v1  ;;  %v419_v27 = vld [vmem:[%s3790_s13 + $0x1b0] sm:$0xff]  ;;  %v426_v29 = vld [vmem:[%s3790_s13 + $0x1e8] sm:$0xff]  ;;  %v428_v31 = vld [vmem:[%s3790_s13 + $0x1f8] sm:$0xff] }
  0x98   : > { %v2529_v33 = vpack.c.bf16 %v419_v27, %v415_v25  ;;  %v2499_v34 = vpack.c.bf16 %v426_v29, %v422_v28  ;;  %v421_v35 = vld [vmem:[%s3790_s13 + $0x1c0] sm:$0xff]  ;;  %v423_v37 = vld [vmem:[%s3790_s13 + $0x1d0] sm:$0xff]  ;;  %v2531_v38 = vpack.c.bf16 %v428_v31, %v424_v30  ;;  %v430_v40 = vld [vmem:[%s3805_s18 + $0x8] sm:$0xff] }
  0x99   : > { %2490 = vmatpush1.bf16.msra.mxu0 %v2489_v7  ;;  %v425_v36 = vld [vmem:[%s3790_s13 + $0x1e0] sm:$0xff]  ;;  %v427_v39 = vld [vmem:[%s3790_s13 + $0x1f0] sm:$0xff]  ;;  %v434_v41 = vld [vmem:[%s3805_s18 + $0x28] sm:$0xff] }
  0x9a   : > { %2522 = vmatpush1.bf16.msra.mxu1 %v2521_v8  ;;  %2492 = vmatprep.subr.bf16.mxu0 %v2491_v9  ;;  %v432_v42 = vld [vmem:[%s3805_s18 + $0x18] sm:$0xff]  ;;  %v2501_v44 = vpack.c.bf16 %v425_v36, %v421_v35  ;;  %v2533_v45 = vpack.c.bf16 %v427_v39, %v423_v37  ;;  %v3881_v46 = vpack.c.bf16 %v434_v41, %v430_v40  ;;  %v429_v47 = vld [vmem:[%s3805_s18] sm:$0xff]  ;;  %v431_v50 = vld [vmem:[%s3805_s18 + $0x10] sm:$0xff] }
  0x9b   : > { %2524 = vmatprep.subr.bf16.mxu1 %v2523_v13  ;;  %v436_v43 = vld [vmem:[%s3805_s18 + $0x38] sm:$0xff]  ;;  %v433_v48 = vld [vmem:[%s3805_s18 + $0x20] sm:$0xff]  ;;  %v435_v51 = vld [vmem:[%s3805_s18 + $0x30] sm:$0xff] }
  0x9c   : > { %v3885_v49 = vpack.c.bf16 %v436_v43, %v432_v42  ;;  %v438_v52 = vld [vmem:[%s3805_s18 + $0x48] sm:$0xff]  ;;  %v494_v54 = vld [vmem:[#allocation2] sm:$0xff]  ;;  %v3891_v55 = vpack.c.bf16 %v433_v48, %v429_v47  ;;  %v440_v56 = vld [vmem:[%s3805_s18 + $0x58] sm:$0xff]  ;;  %v3896_v58 = vpack.c.bf16 %v435_v51, %v431_v50 }
  0x9d   : > { %2494 = vmatpush1.bf16.msra.mxu0 %v2493_v20  ;;  %v442_v53 = vld [vmem:[%s3805_s18 + $0x68] sm:$0xff]  ;;  %v444_v57 = vld [vmem:[%s3805_s18 + $0x78] sm:$0xff]  ;;  %v437_v59 = vld [vmem:[%s3805_s18 + $0x40] sm:$0xff] }
  0x9e   : > { %2526 = vmatpush1.bf16.msra.mxu1 %v2525_v21  ;;  %2496 = vmatprep.subr.bf16.mxu0 %v2495_v22  ;;  %v441_v60 = vld [vmem:[%s3805_s18 + $0x60] sm:$0xff]  ;;  %v3901_v61 = vpack.c.bf16 %v442_v53, %v438_v52  ;;  %v439_v62 = vld [vmem:[%s3805_s18 + $0x50] sm:$0xff]  ;;  %v3905_v0 = vpack.c.bf16 %v444_v57, %v440_v56  ;;  %v446_v1 = vld [vmem:[%s3805_s18 + $0x88] sm:$0xff] }
  0x9f   : > { %2528 = vmatprep.subr.bf16.mxu1 %v2527_v26  ;;  %v443_v63 = vld [vmem:[%s3805_s18 + $0x70] sm:$0xff]  ;;  %v450_v2 = vld [vmem:[%s3805_s18 + $0xa8] sm:$0xff]  ;;  %v3910_v4 = vpack.c.bf16 %v441_v60, %v437_v59  ;;  %v448_v5 = vld [vmem:[%s3805_s18 + $0x98] sm:$0xff] }
  0xa0   : > { %v495_v3 = vld [vmem:[#allocation2 + $0x8] sm:$0xff]  ;;  %v452_v6 = vld [vmem:[%s3805_s18 + $0xb8] sm:$0xff]  ;;  %v3916_v7 = vpack.c.bf16 %v443_v63, %v439_v62  ;;  %v445_v8 = vld [vmem:[%s3805_s18 + $0x80] sm:$0xff]  ;;  %v3922_v10 = vpack.c.bf16 %v450_v2, %v446_v1 }
  0xa1   : > { %2498 = vmatpush1.bf16.msra.mxu0 %v2497_v32  ;;  %v449_v9 = vld [vmem:[%s3805_s18 + $0xa0] sm:$0xff]  ;;  %v447_v11 = vld [vmem:[%s3805_s18 + $0x90] sm:$0xff]  ;;  %v3927_v13 = vpack.c.bf16 %v452_v6, %v448_v5  ;;  %v454_v14 = vld [vmem:[%s3805_s18 + $0xc8] sm:$0xff] }
  0xa2   : > { %2530 = vmatpush1.bf16.msra.mxu1 %v2529_v33  ;;  %2500 = vmatprep.subr.bf16.mxu0 %v2499_v34  ;;  %v451_v12 = vld [vmem:[%s3805_s18 + $0xb0] sm:$0xff]  ;;  %v458_v16 = vld [vmem:[%s3805_s18 + $0xe8] sm:$0xff]  ;;  %v3932_v18 = vpack.c.bf16 %v449_v9, %v445_v8  ;;  %v456_v19 = vld [vmem:[%s3805_s18 + $0xd8] sm:$0xff] }
  0xa3   : > { %2532 = vmatprep.subr.bf16.mxu1 %v2531_v38  ;;  %v496_v17 = vld [vmem:[#allocation2 + $0x10] sm:$0xff]  ;;  %v460_v20 = vld [vmem:[%s3805_s18 + $0xf8] sm:$0xff]  ;;  %v3938_v21 = vpack.c.bf16 %v451_v12, %v447_v11  ;;  %v453_v22 = vld [vmem:[%s3805_s18 + $0xc0] sm:$0xff]  ;;  %v3944_v24 = vpack.c.bf16 %v458_v16, %v454_v14 }
  0xa4   : > { %v457_v23 = vld [vmem:[%s3805_s18 + $0xe0] sm:$0xff]  ;;  %v455_v25 = vld [vmem:[%s3805_s18 + $0xd0] sm:$0xff]  ;;  %v3949_v27 = vpack.c.bf16 %v460_v20, %v456_v19  ;;  %v462_v28 = vld [vmem:[%s3805_s18 + $0x108] sm:$0xff] }
  0xa5   : > { %2502 = vmatpush1.bf16.msra.mxu0 %v2501_v44  ;;  %v459_v26 = vld [vmem:[%s3805_s18 + $0xf0] sm:$0xff]  ;;  %v466_v29 = vld [vmem:[%s3805_s18 + $0x128] sm:$0xff]  ;;  %v497_v30 = vld [vmem:[#allocation2 + $0x18] sm:$0xff]  ;;  %v3954_v31 = vpack.c.bf16 %v457_v23, %v453_v22 }
  0xa6   : > { %2534 = vmatpush1.bf16.msra.mxu1 %v2533_v45  ;;  %2536 = vmatprep.subr.bf16.mxu0 %v3881_v46  ;;  %v464_v32 = vld [vmem:[%s3805_s18 + $0x118] sm:$0xff]  ;;  %v3960_v34 = vpack.c.bf16 %v459_v26, %v455_v25  ;;  %v461_v35 = vld [vmem:[%s3805_s18 + $0x100] sm:$0xff]  ;;  %v3966_v37 = vpack.c.bf16 %v466_v29, %v462_v28  ;;  %v463_v38 = vld [vmem:[%s3805_s18 + $0x110] sm:$0xff] }
  0xa7   : > { %2568 = vmatprep.subr.bf16.mxu1 %v3885_v49  ;;  %v468_v33 = vld [vmem:[%s3805_s18 + $0x138] sm:$0xff]  ;;  %v465_v36 = vld [vmem:[%s3805_s18 + $0x120] sm:$0xff]  ;;  %v467_v39 = vld [vmem:[%s3805_s18 + $0x130] sm:$0xff] }
  0xa8   : > { %588 = vmatmul.mubr.f32.vlgmr.msra.gmra.mrb[0].mxu0 %v494_v54  ;;  %v3971_v40 = vpack.c.bf16 %v468_v33, %v464_v32  ;;  %v470_v41 = vld [vmem:[%s3805_s18 + $0x148] sm:$0xff]  ;;  %v498_v43 = vld [vmem:[#allocation2 + $0x20] sm:$0xff]  ;;  %v3976_v44 = vpack.c.bf16 %v465_v36, %v461_v35  ;;  %v472_v45 = vld [vmem:[%s3805_s18 + $0x158] sm:$0xff]  ;;  %v3982_v48 = vpack.c.bf16 %v467_v39, %v463_v38  ;;  %v503_v36 = vlaneseq }
  0xa9   : > { %701 = vmatmul.mubr.f32.vlgmr.msra.gmra.mrb[0].mxu1 %v494_v54  ;;  %2538 = vmatpush1.bf16.msra.mxu0 %v3891_v55  ;;  %v474_v42 = vld [vmem:[%s3805_s18 + $0x168] sm:$0xff]  ;;  %v476_v47 = vld [vmem:[%s3805_s18 + $0x178] sm:$0xff]  ;;  %v469_v50 = vld [vmem:[%s3805_s18 + $0x140] sm:$0xff] }
  0xaa   : > { %2570 = vmatpush1.bf16.msra.mxu1 %v3896_v58  ;;  %593 = vmatprep.mubr.f32.mxu0 %v3545_v15  ;;  %v473_v51 = vld [vmem:[%s3805_s18 + $0x160] sm:$0xff]  ;;  %v3988_v52 = vpack.c.bf16 %v474_v42, %v470_v41  ;;  %v471_v53 = vld [vmem:[%s3805_s18 + $0x150] sm:$0xff]  ;;  %v3993_v56 = vpack.c.bf16 %v476_v47, %v472_v45  ;;  %v478_v57 = vld [vmem:[%s3805_s18 + $0x188] sm:$0xff]  ;;  %v504_v38 = vshrl.u32 %v503_v36, 7 }
  0xab   : > { %706 = vmatprep.mubr.f32.mxu1 %v3545_v15  ;;  %2540 = vmatprep.subr.bf16.mxu0 %v3901_v61  ;;  %v475_v54 = vld [vmem:[%s3805_s18 + $0x170] sm:$0xff]  ;;  %v482_v59 = vld [vmem:[%s3805_s18 + $0x1a8] sm:$0xff]  ;;  %v3998_v62 = vpack.c.bf16 %v473_v51, %v469_v50  ;;  %v480_v63 = vld [vmem:[%s3805_s18 + $0x198] sm:$0xff] }
  0xac   : > { %594 = vmatmul.mubr.f32.gmra.mrb[2].mxu0 %v495_v3  ;;  %2572 = vmatprep.subr.bf16.mxu1 %v3905_v0  ;;  %v499_v60 = vld [vmem:[#allocation2 + $0x28] sm:$0xff]  ;;  %v484_v1 = vld [vmem:[%s3805_s18 + $0x1b8] sm:$0xff]  ;;  %v4004_v2 = vpack.c.bf16 %v475_v54, %v471_v53  ;;  %v481_v5 = vld [vmem:[%s3805_s18 + $0x1a0] sm:$0xff]  ;;  %v4010_v6 = vpack.c.bf16 %v482_v59, %v478_v57  ;;  %v505_v39 = vsub.s32 0, %v504_v38  ;;  %v509_v42 = vsub.s32 1, %v504_v38 }
  0xad   : > { %707 = vmatmul.mubr.f32.gmra.mrb[2].mxu1 %v495_v3  ;;  %2542 = vmatpush1.bf16.msra.mxu0 %v3910_v4  ;;  %v477_v3 = vld [vmem:[%s3805_s18 + $0x180] sm:$0xff]  ;;  %v479_v8 = vld [vmem:[%s3805_s18 + $0x190] sm:$0xff]  ;;  %v4015_v11 = vpack.c.bf16 %v484_v1, %v480_v63  ;;  %v486_v12 = vld [vmem:[%s3805_s18 + $0x1c8] sm:$0xff]  ;;  %v517_v50 = vsub.s32 3, %v504_v38 }
  0xae   : > { %2574 = vmatpush1.bf16.msra.mxu1 %v3916_v7  ;;  %599 = vmatprep.mubr.f32.mxu0 %v3545_v15  ;;  %v483_v9 = vld [vmem:[%s3805_s18 + $0x1b0] sm:$0xff]  ;;  %v490_v14 = vld [vmem:[%s3805_s18 + $0x1e8] sm:$0xff]  ;;  %v488_v19 = vld [vmem:[%s3805_s18 + $0x1d8] sm:$0xff] }
  0xaf   : > { %712 = vmatprep.mubr.f32.mxu1 %v3545_v15  ;;  %2544 = vmatprep.subr.bf16.mxu0 %v3922_v10  ;;  %v500_v16 = vld [vmem:[#allocation2 + $0x30] sm:$0xff]  ;;  %v492_v20 = vld [vmem:[%s3805_s18 + $0x1f8] sm:$0xff]  ;;  %v4026_v22 = vpack.c.bf16 %v483_v9, %v479_v8  ;;  %v485_v23 = vld [vmem:[%s3805_s18 + $0x1c0] sm:$0xff]  ;;  %v4032_v26 = vpack.c.bf16 %v490_v14, %v486_v12 }
  0xb0   : > { %600 = vmatmul.mubr.f32.gmra.mrb[4].mxu0 %v496_v17  ;;  %2576 = vmatprep.subr.bf16.mxu1 %v3927_v13  ;;  %v489_v25 = vld [vmem:[%s3805_s18 + $0x1e0] sm:$0xff]  ;;  %v487_v28 = vld [vmem:[%s3805_s18 + $0x1d0] sm:$0xff]  ;;  %v501_v32 = vld [vmem:[#allocation2 + $0x38] sm:$0xff] }
  0xb1   : > { %713 = vmatmul.mubr.f32.gmra.mrb[4].mxu1 %v496_v17  ;;  %2546 = vmatpush1.bf16.msra.mxu0 %v3932_v18  ;;  %v4020_v17 = vpack.c.bf16 %v481_v5, %v477_v3  ;;  %v491_v29 = vld [vmem:[%s3805_s18 + $0x1f0] sm:$0xff]  ;;  %v4040_v33 = vpack.c.bf16 %v489_v25, %v485_v23  ;;  %v493_v41 = vld [vmem:[%s3803_s12] sm:$0xf]  ;;  %v513_v3 = vsub.s32 2, %v504_v38 }
  0xb2   : > { %2578 = vmatpush1.bf16.msra.mxu1 %v3938_v21  ;;  %605 = vmatprep.mubr.f32.mxu0 %v3545_v15  ;;  %v4044_v35 = vpack.c.bf16 %v491_v29, %v487_v28  ;;  %v4094_v45 = vrot.slane %v493_v41, %v509_v42  ;;  %v4098_v1 = vrot.slane %v493_v41, %v517_v50 }
  0xb3   : > { %718 = vmatprep.mubr.f32.mxu1 %v3545_v15  ;;  %2548 = vmatprep.subr.bf16.mxu0 %v3944_v24  ;;  %v4101_v8 = vrot.slane %v493_v41, %v513_v3 }
  0xb4   : > { %606 = vmatmul.mubr.f32.gmra.mrb[6].mxu0 %v497_v30  ;;  %2580 = vmatprep.subr.bf16.mxu1 %v3949_v27 }
  0xb5   : > { %719 = vmatmul.mubr.f32.gmra.mrb[6].mxu1 %v497_v30  ;;  %2550 = vmatpush1.bf16.msra.mxu0 %v3954_v31  ;;  %v4037_v30 = vpack.c.bf16 %v492_v20, %v488_v19 }
  0xb6   : > { %2582 = vmatpush1.bf16.msra.mxu1 %v3960_v34  ;;  %611 = vmatprep.mubr.f32.mxu0 %v3545_v15 }
  0xb7   : > { %724 = vmatprep.mubr.f32.mxu1 %v3545_v15  ;;  %2552 = vmatprep.subr.bf16.mxu0 %v3966_v37 }
  0xb8   : > { %612 = vmatmul.mubr.f32.gmra.mrb[8].mxu0 %v498_v43  ;;  %2584 = vmatprep.subr.bf16.mxu1 %v3971_v40 }
  0xb9   : > { %725 = vmatmul.mubr.f32.gmra.mrb[8].mxu1 %v498_v43  ;;  %2554 = vmatpush1.bf16.msra.mxu0 %v3976_v44  ;;  %v4092_v43 = vrot.slane %v493_v41, %v505_v39 }
  0xba   : > { %2586 = vmatpush1.bf16.msra.mxu1 %v3982_v48  ;;  %617 = vmatprep.mubr.f32.mxu0 %v3545_v15 }
  0xbb   : > { %730 = vmatprep.mubr.f32.mxu1 %v3545_v15  ;;  %2556 = vmatprep.subr.bf16.mxu0 %v3988_v52 }
  0xbc   : > { %618 = vmatmul.mubr.f32.gmra.mrb[10].mxu0 %v499_v60  ;;  %2588 = vmatprep.subr.bf16.mxu1 %v3993_v56 }
  0xbd   : > { %731 = vmatmul.mubr.f32.gmra.mrb[10].mxu1 %v499_v60  ;;  %2558 = vmatpush1.bf16.msra.mxu0 %v3998_v62 }
  0xbe   : > { %2590 = vmatpush1.bf16.msra.mxu1 %v4004_v2  ;;  %623 = vmatprep.mubr.f32.mxu0 %v3545_v15 }
  0xbf   : > { %736 = vmatprep.mubr.f32.mxu1 %v3545_v15  ;;  %2560 = vmatprep.subr.bf16.mxu0 %v4010_v6 }
  0xc0   : > { %624 = vmatmul.mubr.f32.gmra.mrb[12].mxu0 %v500_v16  ;;  %2592 = vmatprep.subr.bf16.mxu1 %v4015_v11 }
  0xc1   : > { %737 = vmatmul.mubr.f32.gmra.mrb[12].mxu1 %v500_v16  ;;  %2562 = vmatpush1.bf16.msra.mxu0 %v4020_v17 }
  0xc2   : > { %2594 = vmatpush1.bf16.msra.mxu1 %v4026_v22  ;;  %629 = vmatprep.mubr.f32.mxu0 %v3545_v15 }
  0xc3   : > { %742 = vmatprep.mubr.f32.mxu1 %v3545_v15  ;;  %2564 = vmatprep.subr.bf16.mxu0 %v4032_v26 }
  0xc4   : > { %630 = vmatmul.mubr.f32.gmra.mrb[14].mxu0 %v501_v32  ;;  %2596 = vmatprep.subr.bf16.mxu1 %v4037_v30 }
  0xc5   : > { %743 = vmatmul.mubr.f32.gmra.mrb[14].mxu1 %v501_v32  ;;  %2566 = vmatpush1.bf16.msra.mxu0 %v4040_v33 }
  0xc6   : > { %2598 = vmatpush1.bf16.msra.mxu1 %v4044_v35  ;;  %849 = vmatprep.mubr.f32.mxu0 %v3545_v15 }
  0xc7   : > { %920 = vmatprep.mubr.f32.mxu1 %v3545_v15  ;;  %2600 = vmatprep.subr.bf16.mxu0 %v3881_v46 }
  0xc8   : > { %850 = vmatmul.mubr.f32.vlgmr.msra.gmra.mrb[0].mxu0 %v3545_v15  ;;  %2632 = vmatprep.subr.bf16.mxu1 %v3885_v49 }
  0xc9   : > { %921 = vmatmul.mubr.f32.vlgmr.msra.gmra.mrb[0].mxu1 %v3545_v15  ;;  %2602 = vmatpush1.bf16.msra.mxu0 %v3891_v55 }
  0xca   : > { %2634 = vmatpush1.bf16.msra.mxu1 %v3896_v58  ;;  %2604 = vmatprep.subr.bf16.mxu0 %v3901_v61 }
  0xcb   : > { %2636 = vmatprep.subr.bf16.mxu1 %v3905_v0  ;;  %1025 = vmatprep.mubr.f32.mxu0 %v3545_v15 }
  0xcc   : > { %1096 = vmatprep.mubr.f32.mxu1 %v3545_v15 }
  0xcd   : > { %2606 = vmatpush1.bf16.msra.mxu0 %v3910_v4 }
  0xce   : > { %2638 = vmatpush1.bf16.msra.mxu1 %v3916_v7  ;;  %2608 = vmatprep.subr.bf16.mxu0 %v3922_v10 }
  0xcf   : > { %2640 = vmatprep.subr.bf16.mxu1 %v3927_v13 }
  0xd1   : > { %2610 = vmatpush1.bf16.msra.mxu0 %v3932_v18 }
  0xd2   : > { %2642 = vmatpush1.bf16.msra.mxu1 %v3938_v21  ;;  %2612 = vmatprep.subr.bf16.mxu0 %v3944_v24 }
  0xd3   : > { %2644 = vmatprep.subr.bf16.mxu1 %v3949_v27 }
  0xd5   : > { %2614 = vmatpush1.bf16.msra.mxu0 %v3954_v31 }
  0xd6   : > { %2646 = vmatpush1.bf16.msra.mxu1 %v3960_v34  ;;  %2616 = vmatprep.subr.bf16.mxu0 %v3966_v37 }
  0xd7   : > { %2648 = vmatprep.subr.bf16.mxu1 %v3971_v40 }
  0xd9   : > { %2618 = vmatpush1.bf16.msra.mxu0 %v3976_v44 }
  0xda   : > { %2650 = vmatpush1.bf16.msra.mxu1 %v3982_v48  ;;  %2620 = vmatprep.subr.bf16.mxu0 %v3988_v52 }
  0xdb   : > { %2652 = vmatprep.subr.bf16.mxu1 %v3993_v56 }
  0xdd   : > { %2622 = vmatpush1.bf16.msra.mxu0 %v3998_v62 }
  0xde   : > { %2654 = vmatpush1.bf16.msra.mxu1 %v4004_v2  ;;  %2624 = vmatprep.subr.bf16.mxu0 %v4010_v6 }
  0xdf   : > { %2656 = vmatprep.subr.bf16.mxu1 %v4015_v11 }
  0xe1   : > { %2626 = vmatpush1.bf16.msra.mxu0 %v4020_v17 }
  0xe2   : > { %2658 = vmatpush1.bf16.msra.mxu1 %v4026_v22  ;;  %2628 = vmatprep.subr.bf16.mxu0 %v4032_v26 }
  0xe3   : > { %2660 = vmatprep.subr.bf16.mxu1 %v4037_v30 }
  0xe5   : > { %2630 = vmatpush1.bf16.msra.mxu0 %v4040_v33 }
  0xe6   : > { %2662 = vmatpush1.bf16.msra.mxu1 %v4044_v35  ;;  %2664 = vmatprep.subr.bf16.mxu0 %v3881_v46 }
  0xe7   : > { %2696 = vmatprep.subr.bf16.mxu1 %v3885_v49 }
 0x19b   : > { %v851_v47 = vpop.f32.mrb[0].mxu0 }
 0x19c   : > { %v3047_v51 = vadd.f32 %v851_v47, %v4092_v43  ;;  %v922_v53 = vpop.f32.mrb[0].mxu1  ;;  %v853_v54 = vpop.f32.mrb[1].mxu0 }
 0x19d   : > { %v3048_v57 = vadd.f32 %v853_v54, %v4094_v45  ;;  %v924_v59 = vpop.f32.mrb[1].mxu1  ;;  %v3063_v12 = vadd.f32 %v922_v53, %v4101_v8 }
 0x19e   : > { %v2436_v60 = vmul.f32 -1.442695, %v3047_v51  ;;  %v3064_v5 = vadd.f32 %v924_v59, %v4098_v1 }
 0x19f   : > { %v2437_v63 = vmul.f32 -1.442695, %v3048_v57 }
 0x1a0   : > { %3192 = vpow2.f32 %v2436_v60  ;;  %v2438_v9 = vmul.f32 -1.442695, %v3064_v5 }
 0x1a1   : > { %3194 = vpow2.f32 %v2437_v63 }
 0x1a2   : > { %3196 = vpow2.f32 %v2438_v9 }
 0x1a3   : > { %3198 = vtanh.f32 %v3063_v12 }
 0x1aa   : > { %v3193_v14 = vpop.eup %3192 }
 0x1ab   : > { %v3195_v16 = vpop.eup %3194  ;;  %v934_v19 = vadd.f32 1.0, %v3193_v14 }
 0x1ac   : > { %v940_v20 = vadd.f32 1.0, %v3195_v16  ;;  %v3197_v23 = vpop.eup %3196 }
 0x1ad   : > { %3200 = vrcp.f32 %v934_v19  ;;  %v3199_v25 = vpop.eup %3198  ;;  %v947_v36 = vadd.f32 1.0, %v3197_v23 }
 0x1ae   : > { %3202 = vrcp.f32 %v940_v20 }
 0x1af   : > { %3204 = vrcp.f32 %v947_v36 }
 0x1b7   : > { %v3201_v28 = vpop.eup %3200 }
 0x1b8   : > { %v3203_v29 = vpop.eup %3202  ;;  %v951_v32 = vmul.f32 %v3201_v28, %v3199_v25 }
 0x1b9   : > { %v950_v38 = vmul.f32 0.0, %v3203_v29  ;;  %v3205_v41 = vpop.eup %3204 }
 0x1bb   : > { %v4104_v39 = vadd.f32 %v951_v32, %v950_v38 }
 0x1bd   : > { %3206 = vtanh.f32 %v4104_v39 }
 0x1c7   : > { %v3207_v42 = vpop.eup %3206 }
 0x1c8   : > { %v954_v47 = vmul.f32 %v3207_v42, %v3205_v41 }
 0x1ca   : > { %955 = vst [vmem:[#allocation2] sm:$0xff] %v954_v47  ;;  %1026 = vmatmul.mubr.f32.vlgmr.msra.gmra.mrb[2].mxu0 %v954_v47  ;;  %1097 = vmatmul.mubr.f32.vlgmr.msra.gmra.mrb[2].mxu1 %v954_v47 }
 0x1cb   : > { %2666 = vmatpush1.bf16.msra.mxu0 %v3891_v55  ;;  %2698 = vmatpush1.bf16.msra.mxu1 %v3896_v58 }
 0x1cc   : > { %2668 = vmatprep.subr.bf16.mxu0 %v3901_v61  ;;  %2700 = vmatprep.subr.bf16.mxu1 %v3905_v0 }
 0x1cd   : > { %1202 = vmatprep.mubr.f32.mxu0 %v3545_v15  ;;  %1273 = vmatprep.mubr.f32.mxu1 %v3545_v15 }
 0x1cf   : > { %2670 = vmatpush1.bf16.msra.mxu0 %v3910_v4  ;;  %2702 = vmatpush1.bf16.msra.mxu1 %v3916_v7 }
 0x1d0   : > { %2672 = vmatprep.subr.bf16.mxu0 %v3922_v10  ;;  %2704 = vmatprep.subr.bf16.mxu1 %v3927_v13 }
 0x1d3   : > { %2674 = vmatpush1.bf16.msra.mxu0 %v3932_v18  ;;  %2706 = vmatpush1.bf16.msra.mxu1 %v3938_v21 }
 0x1d4   : > { %2676 = vmatprep.subr.bf16.mxu0 %v3944_v24  ;;  %2708 = vmatprep.subr.bf16.mxu1 %v3949_v27 }
 0x1d7   : > { %2678 = vmatpush1.bf16.msra.mxu0 %v3954_v31  ;;  %2710 = vmatpush1.bf16.msra.mxu1 %v3960_v34 }
 0x1d8   : > { %2680 = vmatprep.subr.bf16.mxu0 %v3966_v37  ;;  %2712 = vmatprep.subr.bf16.mxu1 %v3971_v40 }
 0x1db   : > { %2682 = vmatpush1.bf16.msra.mxu0 %v3976_v44  ;;  %2714 = vmatpush1.bf16.msra.mxu1 %v3982_v48 }
 0x1dc   : > { %2684 = vmatprep.subr.bf16.mxu0 %v3988_v52  ;;  %2716 = vmatprep.subr.bf16.mxu1 %v3993_v56 }
 0x1df   : > { %2686 = vmatpush1.bf16.msra.mxu0 %v3998_v62  ;;  %2718 = vmatpush1.bf16.msra.mxu1 %v4004_v2 }
 0x1e0   : > { %2688 = vmatprep.subr.bf16.mxu0 %v4010_v6  ;;  %2720 = vmatprep.subr.bf16.mxu1 %v4015_v11 }
 0x1e3   : > { %2690 = vmatpush1.bf16.msra.mxu0 %v4020_v17  ;;  %2722 = vmatpush1.bf16.msra.mxu1 %v4026_v22 }
 0x1e4   : > { %2692 = vmatprep.subr.bf16.mxu0 %v4032_v26  ;;  %2724 = vmatprep.subr.bf16.mxu1 %v4037_v30 }
 0x1e7   : > { %2694 = vmatpush1.bf16.msra.mxu0 %v4040_v33  ;;  %2726 = vmatpush1.bf16.msra.mxu1 %v4044_v35 }
 0x1e8   : > { %2728 = vmatprep.subr.bf16.mxu0 %v3881_v46  ;;  %2760 = vmatprep.subr.bf16.mxu1 %v3885_v49 }
 0x29d   : > { %v1027_v50 = vpop.f32.mrb[2].mxu0  ;;  %v1098_v51 = vpop.f32.mrb[2].mxu1 }
 0x29e   : > { %v3049_v53 = vadd.f32 %v1027_v50, %v4092_v43  ;;  %v1029_v54 = vpop.f32.mrb[3].mxu0  ;;  %v1100_v57 = vpop.f32.mrb[3].mxu1  ;;  %v3065_v9 = vadd.f32 %v1098_v51, %v4101_v8 }
 0x29f   : > { %v3050_v59 = vadd.f32 %v1029_v54, %v4094_v45  ;;  %v3066_v3 = vadd.f32 %v1100_v57, %v4098_v1 }
 0x2a0   : > { %v2439_v60 = vmul.f32 -1.442695, %v3049_v53 }
 0x2a1   : > { %v2440_v63 = vmul.f32 -1.442695, %v3050_v59  ;;  %v2441_v5 = vmul.f32 -1.442695, %v3066_v3 }
 0x2a2   : > { %3208 = vpow2.f32 %v2439_v60 }
 0x2a3   : > { %3210 = vpow2.f32 %v2440_v63 }
 0x2a4   : > { %3212 = vpow2.f32 %v2441_v5 }
 0x2a5   : > { %3214 = vtanh.f32 %v3065_v9 }
 0x2ac   : > { %v3209_v12 = vpop.eup %3208 }
 0x2ad   : > { %v3211_v14 = vpop.eup %3210  ;;  %v1110_v16 = vadd.f32 1.0, %v3209_v12 }
 0x2ae   : > { %v1116_v19 = vadd.f32 1.0, %v3211_v14  ;;  %v3213_v20 = vpop.eup %3212 }
 0x2af   : > { %3216 = vrcp.f32 %v1110_v16  ;;  %v3215_v23 = vpop.eup %3214  ;;  %v1123_v32 = vadd.f32 1.0, %v3213_v20 }
 0x2b0   : > { %3218 = vrcp.f32 %v1116_v19 }
 0x2b1   : > { %3220 = vrcp.f32 %v1123_v32 }
 0x2b9   : > { %v3217_v25 = vpop.eup %3216 }
 0x2ba   : > { %v3219_v28 = vpop.eup %3218  ;;  %v1127_v29 = vmul.f32 %v3217_v25, %v3215_v23 }
 0x2bb   : > { %v1126_v36 = vmul.f32 %v3219_v28, %v4104_v39  ;;  %v3221_v41 = vpop.eup %3220 }
 0x2bd   : > { %v4146_v38 = vadd.f32 %v1127_v29, %v1126_v36 }
 0x2bf   : > { %3222 = vtanh.f32 %v4146_v38 }
 0x2c9   : > { %v3223_v42 = vpop.eup %3222 }
 0x2ca   : > { %v1130_v47 = vmul.f32 %v3223_v42, %v3221_v41 }
 0x2cc   : > { %1132 = vst [vmem:[#allocation2 + $0x8] sm:$0xff] %v1130_v47  ;;  %1203 = vmatmul.mubr.f32.vlgmr.msra.gmra.mrb[4].mxu0 %v1130_v47  ;;  %1274 = vmatmul.mubr.f32.vlgmr.msra.gmra.mrb[4].mxu1 %v1130_v47 }
 0x2cd   : > { %2730 = vmatpush1.bf16.msra.mxu0 %v3891_v55  ;;  %2762 = vmatpush1.bf16.msra.mxu1 %v3896_v58 }
 0x2ce   : > { %2732 = vmatprep.subr.bf16.mxu0 %v3901_v61  ;;  %2764 = vmatprep.subr.bf16.mxu1 %v3905_v0 }
 0x2cf   : > { %1379 = vmatprep.mubr.f32.mxu0 %v3545_v15  ;;  %1450 = vmatprep.mubr.f32.mxu1 %v3545_v15 }
 0x2d1   : > { %2734 = vmatpush1.bf16.msra.mxu0 %v3910_v4  ;;  %2766 = vmatpush1.bf16.msra.mxu1 %v3916_v7 }
 0x2d2   : > { %2736 = vmatprep.subr.bf16.mxu0 %v3922_v10  ;;  %2768 = vmatprep.subr.bf16.mxu1 %v3927_v13 }
 0x2d5   : > { %2738 = vmatpush1.bf16.msra.mxu0 %v3932_v18  ;;  %2770 = vmatpush1.bf16.msra.mxu1 %v3938_v21 }
 0x2d6   : > { %2740 = vmatprep.subr.bf16.mxu0 %v3944_v24  ;;  %2772 = vmatprep.subr.bf16.mxu1 %v3949_v27 }
 0x2d9   : > { %2742 = vmatpush1.bf16.msra.mxu0 %v3954_v31  ;;  %2774 = vmatpush1.bf16.msra.mxu1 %v3960_v34 }
 0x2da   : > { %2744 = vmatprep.subr.bf16.mxu0 %v3966_v37  ;;  %2776 = vmatprep.subr.bf16.mxu1 %v3971_v40 }
 0x2dd   : > { %2746 = vmatpush1.bf16.msra.mxu0 %v3976_v44  ;;  %2778 = vmatpush1.bf16.msra.mxu1 %v3982_v48 }
 0x2de   : > { %2748 = vmatprep.subr.bf16.mxu0 %v3988_v52  ;;  %2780 = vmatprep.subr.bf16.mxu1 %v3993_v56 }
 0x2e1   : > { %2750 = vmatpush1.bf16.msra.mxu0 %v3998_v62  ;;  %2782 = vmatpush1.bf16.msra.mxu1 %v4004_v2 }
 0x2e2   : > { %2752 = vmatprep.subr.bf16.mxu0 %v4010_v6  ;;  %2784 = vmatprep.subr.bf16.mxu1 %v4015_v11 }
 0x2e5   : > { %2754 = vmatpush1.bf16.msra.mxu0 %v4020_v17  ;;  %2786 = vmatpush1.bf16.msra.mxu1 %v4026_v22 }
 0x2e6   : > { %2756 = vmatprep.subr.bf16.mxu0 %v4032_v26  ;;  %2788 = vmatprep.subr.bf16.mxu1 %v4037_v30 }
 0x2e9   : > { %2758 = vmatpush1.bf16.msra.mxu0 %v4040_v33  ;;  %2790 = vmatpush1.bf16.msra.mxu1 %v4044_v35 }
 0x2ea   : > { %2792 = vmatprep.subr.bf16.mxu0 %v3881_v46  ;;  %2824 = vmatprep.subr.bf16.mxu1 %v3885_v49 }
 0x39f   : > { %v1204_v39 = vpop.f32.mrb[4].mxu0  ;;  %v1275_v50 = vpop.f32.mrb[4].mxu1 }
 0x3a0   : > { %v3051_v51 = vadd.f32 %v1204_v39, %v4092_v43  ;;  %v1206_v53 = vpop.f32.mrb[5].mxu0  ;;  %v1277_v54 = vpop.f32.mrb[5].mxu1  ;;  %v3067_v5 = vadd.f32 %v1275_v50, %v4101_v8 }
 0x3a1   : > { %v3052_v57 = vadd.f32 %v1206_v53, %v4094_v45  ;;  %v3068_v63 = vadd.f32 %v1277_v54, %v4098_v1 }
 0x3a2   : > { %v2442_v59 = vmul.f32 -1.442695, %v3051_v51 }
 0x3a3   : > { %v2443_v60 = vmul.f32 -1.442695, %v3052_v57  ;;  %v2444_v3 = vmul.f32 -1.442695, %v3068_v63 }
 0x3a4   : > { %3224 = vpow2.f32 %v2442_v59 }
 0x3a5   : > { %3226 = vpow2.f32 %v2443_v60 }
 0x3a6   : > { %3228 = vpow2.f32 %v2444_v3 }
 0x3a7   : > { %3230 = vtanh.f32 %v3067_v5 }
 0x3ae   : > { %v3225_v9 = vpop.eup %3224 }
 0x3af   : > { %v3227_v12 = vpop.eup %3226  ;;  %v1287_v14 = vadd.f32 1.0, %v3225_v9 }
 0x3b0   : > { %v1293_v16 = vadd.f32 1.0, %v3227_v12  ;;  %v3229_v19 = vpop.eup %3228 }
 0x3b1   : > { %3232 = vrcp.f32 %v1287_v14  ;;  %v3231_v20 = vpop.eup %3230  ;;  %v1300_v29 = vadd.f32 1.0, %v3229_v19 }
 0x3b2   : > { %3234 = vrcp.f32 %v1293_v16 }
 0x3b3   : > { %3236 = vrcp.f32 %v1300_v29 }
 0x3bb   : > { %v3233_v23 = vpop.eup %3232 }
 0x3bc   : > { %v3235_v25 = vpop.eup %3234  ;;  %v1304_v28 = vmul.f32 %v3233_v23, %v3231_v20 }
 0x3bd   : > { %v1303_v32 = vmul.f32 %v3235_v25, %v4146_v38  ;;  %v3237_v41 = vpop.eup %3236 }
 0x3bf   : > { %v4188_v36 = vadd.f32 %v1304_v28, %v1303_v32 }
 0x3c1   : > { %3238 = vtanh.f32 %v4188_v36 }
 0x3cb   : > { %v3239_v42 = vpop.eup %3238 }
 0x3cc   : > { %v1307_v47 = vmul.f32 %v3239_v42, %v3237_v41 }
 0x3ce   : > { %1309 = vst [vmem:[#allocation2 + $0x10] sm:$0xff] %v1307_v47  ;;  %1380 = vmatmul.mubr.f32.vlgmr.msra.gmra.mrb[6].mxu0 %v1307_v47  ;;  %1451 = vmatmul.mubr.f32.vlgmr.msra.gmra.mrb[6].mxu1 %v1307_v47 }
 0x3cf   : > { %2794 = vmatpush1.bf16.msra.mxu0 %v3891_v55  ;;  %2826 = vmatpush1.bf16.msra.mxu1 %v3896_v58 }
 0x3d0   : > { %2796 = vmatprep.subr.bf16.mxu0 %v3901_v61  ;;  %2828 = vmatprep.subr.bf16.mxu1 %v3905_v0 }
 0x3d1   : > { %1556 = vmatprep.mubr.f32.mxu0 %v3545_v15  ;;  %1627 = vmatprep.mubr.f32.mxu1 %v3545_v15 }
 0x3d3   : > { %2798 = vmatpush1.bf16.msra.mxu0 %v3910_v4  ;;  %2830 = vmatpush1.bf16.msra.mxu1 %v3916_v7 }
 0x3d4   : > { %2800 = vmatprep.subr.bf16.mxu0 %v3922_v10  ;;  %2832 = vmatprep.subr.bf16.mxu1 %v3927_v13 }
 0x3d7   : > { %2802 = vmatpush1.bf16.msra.mxu0 %v3932_v18  ;;  %2834 = vmatpush1.bf16.msra.mxu1 %v3938_v21 }
 0x3d8   : > { %2804 = vmatprep.subr.bf16.mxu0 %v3944_v24  ;;  %2836 = vmatprep.subr.bf16.mxu1 %v3949_v27 }
 0x3db   : > { %2806 = vmatpush1.bf16.msra.mxu0 %v3954_v31  ;;  %2838 = vmatpush1.bf16.msra.mxu1 %v3960_v34 }
 0x3dc   : > { %2808 = vmatprep.subr.bf16.mxu0 %v3966_v37  ;;  %2840 = vmatprep.subr.bf16.mxu1 %v3971_v40 }
 0x3df   : > { %2810 = vmatpush1.bf16.msra.mxu0 %v3976_v44  ;;  %2842 = vmatpush1.bf16.msra.mxu1 %v3982_v48 }
 0x3e0   : > { %2812 = vmatprep.subr.bf16.mxu0 %v3988_v52  ;;  %2844 = vmatprep.subr.bf16.mxu1 %v3993_v56 }
 0x3e3   : > { %2814 = vmatpush1.bf16.msra.mxu0 %v3998_v62  ;;  %2846 = vmatpush1.bf16.msra.mxu1 %v4004_v2 }
 0x3e4   : > { %2816 = vmatprep.subr.bf16.mxu0 %v4010_v6  ;;  %2848 = vmatprep.subr.bf16.mxu1 %v4015_v11 }
 0x3e7   : > { %2818 = vmatpush1.bf16.msra.mxu0 %v4020_v17  ;;  %2850 = vmatpush1.bf16.msra.mxu1 %v4026_v22 }
 0x3e8   : > { %2820 = vmatprep.subr.bf16.mxu0 %v4032_v26  ;;  %2852 = vmatprep.subr.bf16.mxu1 %v4037_v30 }
 0x3eb   : > { %2822 = vmatpush1.bf16.msra.mxu0 %v4040_v33  ;;  %2854 = vmatpush1.bf16.msra.mxu1 %v4044_v35 }
 0x3ec   : > { %2856 = vmatprep.subr.bf16.mxu0 %v3881_v46  ;;  %2888 = vmatprep.subr.bf16.mxu1 %v3885_v49 }
 0x4a1   : > { %v1381_v38 = vpop.f32.mrb[6].mxu0  ;;  %v1452_v39 = vpop.f32.mrb[6].mxu1 }
 0x4a2   : > { %v3053_v50 = vadd.f32 %v1381_v38, %v4092_v43  ;;  %v1383_v51 = vpop.f32.mrb[7].mxu0  ;;  %v1454_v53 = vpop.f32.mrb[7].mxu1  ;;  %v3069_v3 = vadd.f32 %v1452_v39, %v4101_v8 }
 0x4a3   : > { %v3054_v54 = vadd.f32 %v1383_v51, %v4094_v45  ;;  %v3070_v60 = vadd.f32 %v1454_v53, %v4098_v1 }
 0x4a4   : > { %v2445_v57 = vmul.f32 -1.442695, %v3053_v50 }
 0x4a5   : > { %v2446_v59 = vmul.f32 -1.442695, %v3054_v54  ;;  %v2447_v63 = vmul.f32 -1.442695, %v3070_v60 }
 0x4a6   : > { %3240 = vpow2.f32 %v2445_v57 }
 0x4a7   : > { %3242 = vpow2.f32 %v2446_v59 }
 0x4a8   : > { %3244 = vpow2.f32 %v2447_v63 }
 0x4a9   : > { %3246 = vtanh.f32 %v3069_v3 }
 0x4b0   : > { %v3241_v5 = vpop.eup %3240 }
 0x4b1   : > { %v3243_v9 = vpop.eup %3242  ;;  %v1464_v12 = vadd.f32 1.0, %v3241_v5 }
 0x4b2   : > { %v1470_v14 = vadd.f32 1.0, %v3243_v9  ;;  %v3245_v16 = vpop.eup %3244 }
 0x4b3   : > { %3248 = vrcp.f32 %v1464_v12  ;;  %v3247_v19 = vpop.eup %3246  ;;  %v1477_v28 = vadd.f32 1.0, %v3245_v16 }
 0x4b4   : > { %3250 = vrcp.f32 %v1470_v14 }
 0x4b5   : > { %3252 = vrcp.f32 %v1477_v28 }
 0x4bd   : > { %v3249_v20 = vpop.eup %3248 }
 0x4be   : > { %v3251_v23 = vpop.eup %3250  ;;  %v1481_v25 = vmul.f32 %v3249_v20, %v3247_v19 }
 0x4bf   : > { %v1480_v29 = vmul.f32 %v3251_v23, %v4188_v36  ;;  %v3253_v41 = vpop.eup %3252 }
 0x4c1   : > { %v4230_v32 = vadd.f32 %v1481_v25, %v1480_v29 }
 0x4c3   : > { %3254 = vtanh.f32 %v4230_v32 }
 0x4cd   : > { %v3255_v42 = vpop.eup %3254 }
 0x4ce   : > { %v1484_v47 = vmul.f32 %v3255_v42, %v3253_v41 }
 0x4d0   : > { %1486 = vst [vmem:[#allocation2 + $0x18] sm:$0xff] %v1484_v47  ;;  %1557 = vmatmul.mubr.f32.vlgmr.msra.gmra.mrb[8].mxu0 %v1484_v47  ;;  %1628 = vmatmul.mubr.f32.vlgmr.msra.gmra.mrb[8].mxu1 %v1484_v47 }
 0x4d1   : > { %2858 = vmatpush1.bf16.msra.mxu0 %v3891_v55  ;;  %2890 = vmatpush1.bf16.msra.mxu1 %v3896_v58 }
 0x4d2   : > { %2860 = vmatprep.subr.bf16.mxu0 %v3901_v61  ;;  %2892 = vmatprep.subr.bf16.mxu1 %v3905_v0 }
 0x4d3   : > { %1733 = vmatprep.mubr.f32.mxu0 %v3545_v15  ;;  %1804 = vmatprep.mubr.f32.mxu1 %v3545_v15 }
 0x4d5   : > { %2862 = vmatpush1.bf16.msra.mxu0 %v3910_v4  ;;  %2894 = vmatpush1.bf16.msra.mxu1 %v3916_v7 }
 0x4d6   : > { %2864 = vmatprep.subr.bf16.mxu0 %v3922_v10  ;;  %2896 = vmatprep.subr.bf16.mxu1 %v3927_v13 }
 0x4d9   : > { %2866 = vmatpush1.bf16.msra.mxu0 %v3932_v18  ;;  %2898 = vmatpush1.bf16.msra.mxu1 %v3938_v21 }
 0x4da   : > { %2868 = vmatprep.subr.bf16.mxu0 %v3944_v24  ;;  %2900 = vmatprep.subr.bf16.mxu1 %v3949_v27 }
 0x4dd   : > { %2870 = vmatpush1.bf16.msra.mxu0 %v3954_v31  ;;  %2902 = vmatpush1.bf16.msra.mxu1 %v3960_v34 }
 0x4de   : > { %2872 = vmatprep.subr.bf16.mxu0 %v3966_v37  ;;  %2904 = vmatprep.subr.bf16.mxu1 %v3971_v40 }
 0x4e1   : > { %2874 = vmatpush1.bf16.msra.mxu0 %v3976_v44  ;;  %2906 = vmatpush1.bf16.msra.mxu1 %v3982_v48 }
 0x4e2   : > { %2876 = vmatprep.subr.bf16.mxu0 %v3988_v52  ;;  %2908 = vmatprep.subr.bf16.mxu1 %v3993_v56 }
 0x4e5   : > { %2878 = vmatpush1.bf16.msra.mxu0 %v3998_v62  ;;  %2910 = vmatpush1.bf16.msra.mxu1 %v4004_v2 }
 0x4e6   : > { %2880 = vmatprep.subr.bf16.mxu0 %v4010_v6  ;;  %2912 = vmatprep.subr.bf16.mxu1 %v4015_v11 }
 0x4e9   : > { %2882 = vmatpush1.bf16.msra.mxu0 %v4020_v17  ;;  %2914 = vmatpush1.bf16.msra.mxu1 %v4026_v22 }
 0x4ea   : > { %2884 = vmatprep.subr.bf16.mxu0 %v4032_v26  ;;  %2916 = vmatprep.subr.bf16.mxu1 %v4037_v30 }
 0x4ed   : > { %2886 = vmatpush1.bf16.msra.mxu0 %v4040_v33  ;;  %2918 = vmatpush1.bf16.msra.mxu1 %v4044_v35 }
 0x4ee   : > { %2920 = vmatprep.subr.bf16.mxu0 %v3881_v46  ;;  %2952 = vmatprep.subr.bf16.mxu1 %v3885_v49 }
 0x5a3   : > { %v1558_v36 = vpop.f32.mrb[8].mxu0  ;;  %v1629_v38 = vpop.f32.mrb[8].mxu1 }
 0x5a4   : > { %v3055_v39 = vadd.f32 %v1558_v36, %v4092_v43  ;;  %v1560_v50 = vpop.f32.mrb[9].mxu0  ;;  %v1631_v51 = vpop.f32.mrb[9].mxu1  ;;  %v3071_v63 = vadd.f32 %v1629_v38, %v4101_v8 }
 0x5a5   : > { %v3056_v53 = vadd.f32 %v1560_v50, %v4094_v45  ;;  %v3072_v59 = vadd.f32 %v1631_v51, %v4098_v1 }
 0x5a6   : > { %v2448_v54 = vmul.f32 -1.442695, %v3055_v39 }
 0x5a7   : > { %v2449_v57 = vmul.f32 -1.442695, %v3056_v53  ;;  %v2450_v60 = vmul.f32 -1.442695, %v3072_v59 }
 0x5a8   : > { %3256 = vpow2.f32 %v2448_v54 }
 0x5a9   : > { %3258 = vpow2.f32 %v2449_v57 }
 0x5aa   : > { %3260 = vpow2.f32 %v2450_v60 }
 0x5ab   : > { %3262 = vtanh.f32 %v3071_v63 }
 0x5b2   : > { %v3257_v3 = vpop.eup %3256 }
 0x5b3   : > { %v3259_v5 = vpop.eup %3258  ;;  %v1641_v9 = vadd.f32 1.0, %v3257_v3 }
 0x5b4   : > { %v1647_v12 = vadd.f32 1.0, %v3259_v5  ;;  %v3261_v14 = vpop.eup %3260 }
 0x5b5   : > { %3264 = vrcp.f32 %v1641_v9  ;;  %v3263_v16 = vpop.eup %3262  ;;  %v1654_v25 = vadd.f32 1.0, %v3261_v14 }
 0x5b6   : > { %3266 = vrcp.f32 %v1647_v12 }
 0x5b7   : > { %3268 = vrcp.f32 %v1654_v25 }
 0x5bf   : > { %v3265_v19 = vpop.eup %3264 }
 0x5c0   : > { %v3267_v20 = vpop.eup %3266  ;;  %v1658_v23 = vmul.f32 %v3265_v19, %v3263_v16 }
 0x5c1   : > { %v1657_v28 = vmul.f32 %v3267_v20, %v4230_v32  ;;  %v3269_v41 = vpop.eup %3268 }
 0x5c3   : > { %v4272_v29 = vadd.f32 %v1658_v23, %v1657_v28 }
 0x5c5   : > { %3270 = vtanh.f32 %v4272_v29 }
 0x5cf   : > { %v3271_v42 = vpop.eup %3270 }
 0x5d0   : > { %v1661_v47 = vmul.f32 %v3271_v42, %v3269_v41 }
 0x5d2   : > { %1663 = vst [vmem:[#allocation2 + $0x20] sm:$0xff] %v1661_v47  ;;  %1734 = vmatmul.mubr.f32.vlgmr.msra.gmra.mrb[10].mxu0 %v1661_v47  ;;  %1805 = vmatmul.mubr.f32.vlgmr.msra.gmra.mrb[10].mxu1 %v1661_v47 }
 0x5d3   : > { %2922 = vmatpush1.bf16.msra.mxu0 %v3891_v55  ;;  %2954 = vmatpush1.bf16.msra.mxu1 %v3896_v58 }
 0x5d4   : > { %2924 = vmatprep.subr.bf16.mxu0 %v3901_v61  ;;  %2956 = vmatprep.subr.bf16.mxu1 %v3905_v0 }
 0x5d5   : > { %1910 = vmatprep.mubr.f32.mxu0 %v3545_v15  ;;  %1981 = vmatprep.mubr.f32.mxu1 %v3545_v15 }
 0x5d7   : > { %2926 = vmatpush1.bf16.msra.mxu0 %v3910_v4  ;;  %2958 = vmatpush1.bf16.msra.mxu1 %v3916_v7 }
 0x5d8   : > { %2928 = vmatprep.subr.bf16.mxu0 %v3922_v10  ;;  %2960 = vmatprep.subr.bf16.mxu1 %v3927_v13 }
 0x5db   : > { %2930 = vmatpush1.bf16.msra.mxu0 %v3932_v18  ;;  %2962 = vmatpush1.bf16.msra.mxu1 %v3938_v21 }
 0x5dc   : > { %2932 = vmatprep.subr.bf16.mxu0 %v3944_v24  ;;  %2964 = vmatprep.subr.bf16.mxu1 %v3949_v27 }
 0x5df   : > { %2934 = vmatpush1.bf16.msra.mxu0 %v3954_v31  ;;  %2966 = vmatpush1.bf16.msra.mxu1 %v3960_v34 }
 0x5e0   : > { %2936 = vmatprep.subr.bf16.mxu0 %v3966_v37  ;;  %2968 = vmatprep.subr.bf16.mxu1 %v3971_v40 }
 0x5e3   : > { %2938 = vmatpush1.bf16.msra.mxu0 %v3976_v44  ;;  %2970 = vmatpush1.bf16.msra.mxu1 %v3982_v48 }
 0x5e4   : > { %2940 = vmatprep.subr.bf16.mxu0 %v3988_v52  ;;  %2972 = vmatprep.subr.bf16.mxu1 %v3993_v56 }
 0x5e7   : > { %2942 = vmatpush1.bf16.msra.mxu0 %v3998_v62  ;;  %2974 = vmatpush1.bf16.msra.mxu1 %v4004_v2 }
 0x5e8   : > { %2944 = vmatprep.subr.bf16.mxu0 %v4010_v6  ;;  %2976 = vmatprep.subr.bf16.mxu1 %v4015_v11 }
 0x5eb   : > { %2946 = vmatpush1.bf16.msra.mxu0 %v4020_v17  ;;  %2978 = vmatpush1.bf16.msra.mxu1 %v4026_v22 }
 0x5ec   : > { %2948 = vmatprep.subr.bf16.mxu0 %v4032_v26  ;;  %2980 = vmatprep.subr.bf16.mxu1 %v4037_v30 }
 0x5ef   : > { %2950 = vmatpush1.bf16.msra.mxu0 %v4040_v33  ;;  %2982 = vmatpush1.bf16.msra.mxu1 %v4044_v35 }
 0x5f0   : > { %2984 = vmatprep.subr.bf16.mxu0 %v3881_v46  ;;  %3016 = vmatprep.subr.bf16.mxu1 %v3885_v49 }
 0x6a5   : > { %v1735_v32 = vpop.f32.mrb[10].mxu0  ;;  %v1806_v36 = vpop.f32.mrb[10].mxu1 }
 0x6a6   : > { %v3057_v38 = vadd.f32 %v1735_v32, %v4092_v43  ;;  %v1737_v39 = vpop.f32.mrb[11].mxu0  ;;  %v1808_v50 = vpop.f32.mrb[11].mxu1  ;;  %v3073_v60 = vadd.f32 %v1806_v36, %v4101_v8 }
 0x6a7   : > { %v3058_v51 = vadd.f32 %v1737_v39, %v4094_v45  ;;  %v3074_v57 = vadd.f32 %v1808_v50, %v4098_v1 }
 0x6a8   : > { %v2451_v53 = vmul.f32 -1.442695, %v3057_v38 }
 0x6a9   : > { %v2452_v54 = vmul.f32 -1.442695, %v3058_v51  ;;  %v2453_v59 = vmul.f32 -1.442695, %v3074_v57 }
 0x6aa   : > { %3272 = vpow2.f32 %v2451_v53 }
 0x6ab   : > { %3274 = vpow2.f32 %v2452_v54 }
 0x6ac   : > { %3276 = vpow2.f32 %v2453_v59 }
 0x6ad   : > { %3278 = vtanh.f32 %v3073_v60 }
 0x6b4   : > { %v3273_v46 = vpop.eup %3272 }
 0x6b5   : > { %v3275_v63 = vpop.eup %3274  ;;  %v1818_v49 = vadd.f32 1.0, %v3273_v46 }
 0x6b6   : > { %v1824_v3 = vadd.f32 1.0, %v3275_v63  ;;  %v3277_v5 = vpop.eup %3276 }
 0x6b7   : > { %3280 = vrcp.f32 %v1818_v49  ;;  %v3279_v9 = vpop.eup %3278  ;;  %v1831_v19 = vadd.f32 1.0, %v3277_v5  ;;  %v2202_v5 = vld [vmem:[#allocation2 + $0x8] sm:$0xff] (!%p2460_p0) }
 0x6b8   : > { %3282 = vrcp.f32 %v1824_v3  ;;  %v2201_v3 = vld [vmem:[#allocation2] sm:$0xff] (!%p2460_p0)  ;;  %2210 = vst [vmem:[#allocation10 + $0x8] sm:$0xff] (!%p2460_p0), %v2202_v5 }
 0x6b9   : > { %3284 = vrcp.f32 %v1831_v19  ;;  %2209 = vst [vmem:[#allocation10] sm:$0xff] (!%p2460_p0), %v2201_v3 }
 0x6c1   : > { %v3281_v12 = vpop.eup %3280 }
 0x6c2   : > { %v3283_v14 = vpop.eup %3282  ;;  %v1835_v16 = vmul.f32 %v3281_v12, %v3279_v9  ;;  %v2203_v9 = vld [vmem:[#allocation2 + $0x10] sm:$0xff] (!%p2460_p0)  ;;  %v2204_v12 = vld [vmem:[#allocation2 + $0x18] sm:$0xff] (!%p2460_p0) }
 0x6c3   : > { %v1834_v20 = vmul.f32 %v3283_v14, %v4272_v29  ;;  %v3285_v25 = vpop.eup %3284  ;;  %2211 = vst [vmem:[#allocation10 + $0x10] sm:$0xff] (!%p2460_p0), %v2203_v9  ;;  %v2205_v14 = vld [vmem:[#allocation2 + $0x20] sm:$0xff] (!%p2460_p0)  ;;  %2212 = vst [vmem:[#allocation10 + $0x18] sm:$0xff] (!%p2460_p0), %v2204_v12 }
 0x6c4   : > { %2213 = vst [vmem:[#allocation10 + $0x20] sm:$0xff] (!%p2460_p0), %v2205_v14 }
 0x6c5   : > { %v4314_v23 = vadd.f32 %v1835_v16, %v1834_v20 }
 0x6c7   : > { %3286 = vtanh.f32 %v4314_v23 }
 0x6d1   : > { %v3287_v28 = vpop.eup %3286 }
 0x6d2   : > { %v1838_v41 = vmul.f32 %v3287_v28, %v3285_v25 }
 0x6d4   : > { %1840 = vst [vmem:[#allocation2 + $0x28] sm:$0xff] %v1838_v41  ;;  %1911 = vmatmul.mubr.f32.vlgmr.msra.gmra.mrb[12].mxu0 %v1838_v41  ;;  %1982 = vmatmul.mubr.f32.vlgmr.msra.gmra.mrb[12].mxu1 %v1838_v41 }
 0x6d5   : > { %2986 = vmatpush1.bf16.msra.mxu0 %v3891_v55  ;;  %3018 = vmatpush1.bf16.msra.mxu1 %v3896_v58 }
 0x6d6   : > { %2988 = vmatprep.subr.bf16.mxu0 %v3901_v61  ;;  %3020 = vmatprep.subr.bf16.mxu1 %v3905_v0 }
 0x6d7   : > { %2087 = vmatprep.mubr.f32.mxu0 %v3545_v15  ;;  %2158 = vmatprep.mubr.f32.mxu1 %v3545_v15 }
 0x6d9   : > { %2990 = vmatpush1.bf16.msra.mxu0 %v3910_v4  ;;  %3022 = vmatpush1.bf16.msra.mxu1 %v3916_v7 }
 0x6da   : > { %2992 = vmatprep.subr.bf16.mxu0 %v3922_v10  ;;  %3024 = vmatprep.subr.bf16.mxu1 %v3927_v13 }
 0x6db   : > { %v2206_v16 = vld [vmem:[#allocation2 + $0x28] sm:$0xff] (!%p2460_p0) }
 0x6dc   : > { %2214 = vst [vmem:[#allocation10 + $0x28] sm:$0xff] (!%p2460_p0), %v2206_v16 }
 0x6dd   : > { %2994 = vmatpush1.bf16.msra.mxu0 %v3932_v18  ;;  %3026 = vmatpush1.bf16.msra.mxu1 %v3938_v21 }
 0x6de   : > { %2996 = vmatprep.subr.bf16.mxu0 %v3944_v24  ;;  %3028 = vmatprep.subr.bf16.mxu1 %v3949_v27 }
 0x6e1   : > { %2998 = vmatpush1.bf16.msra.mxu0 %v3954_v31  ;;  %3030 = vmatpush1.bf16.msra.mxu1 %v3960_v34 }
 0x6e2   : > { %3000 = vmatprep.subr.bf16.mxu0 %v3966_v37  ;;  %3032 = vmatprep.subr.bf16.mxu1 %v3971_v40 }
 0x6e5   : > { %3002 = vmatpush1.bf16.msra.mxu0 %v3976_v44  ;;  %3034 = vmatpush1.bf16.msra.mxu1 %v3982_v48 }
 0x6e6   : > { %3004 = vmatprep.subr.bf16.mxu0 %v3988_v52  ;;  %3036 = vmatprep.subr.bf16.mxu1 %v3993_v56 }
 0x6e9   : > { %3006 = vmatpush1.bf16.msra.mxu0 %v3998_v62  ;;  %3038 = vmatpush1.bf16.msra.mxu1 %v4004_v2 }
 0x6ea   : > { %3008 = vmatprep.subr.bf16.mxu0 %v4010_v6  ;;  %3040 = vmatprep.subr.bf16.mxu1 %v4015_v11 }
 0x6ed   : > { %3010 = vmatpush1.bf16.msra.mxu0 %v4020_v17  ;;  %3042 = vmatpush1.bf16.msra.mxu1 %v4026_v22 }
 0x6ee   : > { %3012 = vmatprep.subr.bf16.mxu0 %v4032_v26  ;;  %3044 = vmatprep.subr.bf16.mxu1 %v4037_v30 }
 0x6f1   : > { %3014 = vmatpush1.bf16.msra.mxu0 %v4040_v33  ;;  %3046 = vmatpush1.bf16.msra.mxu1 %v4044_v35 }
 0x7a7   : > { %v1912_v15 = vpop.f32.mrb[12].mxu0  ;;  %v1983_v55 = vpop.f32.mrb[12].mxu1 }
 0x7a8   : > { %v3059_v58 = vadd.f32 %v1912_v15, %v4092_v43  ;;  %v1914_v61 = vpop.f32.mrb[13].mxu0  ;;  %v1985_v0 = vpop.f32.mrb[13].mxu1  ;;  %v3075_v21 = vadd.f32 %v1983_v55, %v4101_v8 }
 0x7a9   : > { %v3060_v4 = vadd.f32 %v1914_v61, %v4094_v45  ;;  %v3076_v13 = vadd.f32 %v1985_v0, %v4098_v1 }
 0x7aa   : > { %v2454_v7 = vmul.f32 -1.442695, %v3059_v58 }
 0x7ab   : > { %v2455_v10 = vmul.f32 -1.442695, %v3060_v4  ;;  %v2456_v18 = vmul.f32 -1.442695, %v3076_v13 }
 0x7ac   : > { %3288 = vpow2.f32 %v2454_v7 }
 0x7ad   : > { %3290 = vpow2.f32 %v2455_v10 }
 0x7ae   : > { %3292 = vpow2.f32 %v2456_v18 }
 0x7af   : > { %3294 = vtanh.f32 %v3075_v21 }
 0x7b6   : > { %v3289_v24 = vpop.eup %3288 }
 0x7b7   : > { %v3291_v27 = vpop.eup %3290  ;;  %v1995_v31 = vadd.f32 1.0, %v3289_v24 }
 0x7b8   : > { %v2001_v34 = vadd.f32 1.0, %v3291_v27  ;;  %v3293_v37 = vpop.eup %3292 }
 0x7b9   : > { %3296 = vrcp.f32 %v1995_v31  ;;  %v3295_v40 = vpop.eup %3294  ;;  %v2008_v56 = vadd.f32 1.0, %v3293_v37 }
 0x7ba   : > { %3298 = vrcp.f32 %v2001_v34 }
 0x7bb   : > { %3300 = vrcp.f32 %v2008_v56 }
 0x7c3   : > { %v3297_v44 = vpop.eup %3296 }
 0x7c4   : > { %v3299_v48 = vpop.eup %3298  ;;  %v2012_v52 = vmul.f32 %v3297_v44, %v3295_v40 }
 0x7c5   : > { %v2011_v62 = vmul.f32 %v3299_v48, %v4314_v23  ;;  %v3301_v6 = vpop.eup %3300 }
 0x7c7   : > { %v2013_v2 = vadd.f32 %v2012_v52, %v2011_v62 }
 0x7c9   : > { %3302 = vtanh.f32 %v2013_v2 }
 0x7d3   : > { %v3303_v11 = vpop.eup %3302 }
 0x7d4   : > { %v2015_v17 = vmul.f32 %v3303_v11, %v3301_v6 }
 0x7d6   : > { %2017 = vst [vmem:[#allocation2 + $0x30] sm:$0xff] %v2015_v17  ;;  %2088 = vmatmul.mubr.f32.vlgmr.msra.gmra.mrb[14].mxu0 %v2015_v17  ;;  %2159 = vmatmul.mubr.f32.vlgmr.msra.gmra.mrb[14].mxu1 %v2015_v17 }
 0x7dd   : > { %v2207_v19 = vld [vmem:[#allocation2 + $0x30] sm:$0xff] (!%p2460_p0) }
 0x7de   : > { %2215 = vst [vmem:[#allocation10 + $0x30] sm:$0xff] (!%p2460_p0), %v2207_v19 }
 0x8a9   : > { %v2089_v22 = vpop.f32.mrb[14].mxu0  ;;  %v2160_v26 = vpop.f32.mrb[14].mxu1 }
 0x8aa   : > { %v3061_v30 = vadd.f32 %v2089_v22, %v4092_v43  ;;  %v2091_v33 = vpop.f32.mrb[15].mxu0  ;;  %v2162_v35 = vpop.f32.mrb[15].mxu1  ;;  %v3077_v38 = vadd.f32 %v2160_v26, %v4101_v8 }
 0x8ab   : > { %v3062_v29 = vadd.f32 %v2091_v33, %v4094_v45  ;;  %v3078_v32 = vadd.f32 %v2162_v35, %v4098_v1 }
 0x8ac   : > { %v2457_v42 = vmul.f32 -1.442695, %v3061_v30 }
 0x8ad   : > { %v2458_v47 = vmul.f32 -1.442695, %v3062_v29  ;;  %v2459_v36 = vmul.f32 -1.442695, %v3078_v32 }
 0x8ae   : > { %3304 = vpow2.f32 %v2457_v42 }
 0x8af   : > { %3306 = vpow2.f32 %v2458_v47 }
 0x8b0   : > { %3308 = vpow2.f32 %v2459_v36 }
 0x8b1   : > { %3310 = vtanh.f32 %v3077_v38 }
 0x8b8   : > { %v3305_v39 = vpop.eup %3304 }
 0x8b9   : > { %v3307_v50 = vpop.eup %3306  ;;  %v2172_v51 = vadd.f32 1.0, %v3305_v39 }
 0x8ba   : > { %v2178_v43 = vadd.f32 1.0, %v3307_v50  ;;  %v3309_v45 = vpop.eup %3308 }
 0x8bb   : > { %3312 = vrcp.f32 %v2172_v51  ;;  %v3311_v53 = vpop.eup %3310  ;;  %v2185_v60 = vadd.f32 1.0, %v3309_v45 }
 0x8bc   : > { %3314 = vrcp.f32 %v2178_v43 }
 0x8bd   : > { %3316 = vrcp.f32 %v2185_v60 }
 0x8c5   : > { %v3313_v54 = vpop.eup %3312 }
 0x8c6   : > { %v3315_v57 = vpop.eup %3314  ;;  %v2189_v59 = vmul.f32 %v3313_v54, %v3311_v53 }
 0x8c7   : > { %v2188_v1 = vmul.f32 %v3315_v57, %v2013_v2  ;;  %v3317_v8 = vpop.eup %3316 }
 0x8c9   : > { %v2190_v46 = vadd.f32 %v2189_v59, %v2188_v1 }
 0x8cb   : > { %3318 = vtanh.f32 %v2190_v46  ;;  %2196 = vst [vmem:[%s340_s16] sm:$0xff] %v2190_v46 }
 0x8d2   : > { %2200 = sbr.rel (%p2460_p0) target bundleno = 2273 (0x8e1), region = 56 }
 0x8d5   : > { %v3319_v63 = vpop.eup %3318 }
 0x8d6   : > { %v2192_v49 = vmul.f32 %v3319_v63, %v3317_v8 }
 0x8d8   : > { %2194 = vst [vmem:[#allocation2 + $0x38] sm:$0xff] %v2192_v49  ;;  %2195 = vst [vmem:[%s333_s20] sm:$0xff] %v2192_v49 }
 0x8df   : > { %v2208_v20 = vld [vmem:[#allocation2 + $0x38] sm:$0xff] }
 0x8e0   : > { %2216 = vst [vmem:[#allocation10 + $0x38] sm:$0xff] %v2208_v20 }
 0x8e1 PF: > { %s2464_s7 = sshll.u32 %s3682_s26, 7  ;;  %s2249_s14 = sshll.u32 %s333_s20, 4  ;;  %s2250_s14 = int_to_ptr.vmem [resolvable:$true] %s2249_s14 }
 0x8e2   : > { %s4369_s30 = scalar_lea.hbm %s4468_s5, %s2464_s7  ;;  %s4375_s13 = scalar_lea.sflag [#allocation12], %s285_s17 }
 0x8e3   : > { %s3408_s29 = scalar_lea.vmem %s2250_s14, 128  ;;  %p4491_p2 = scmp.ne.s32.totalorder %s4479_s8, 0 }
 0x8e4   : > { %p3409_p3 = scmp.ne.s32.totalorder %s2250_s14, %s3408_s29  ;;  %s3546_s9 = smov [#allocation11]  }
 0x8e5   : > { %s3412_s15 = sshll.u32 %s3546_s9, 4  ;;  %s3413_s15 = int_to_ptr.vmem [resolvable:$false] %s3412_s15 }
 0x8e6   : > { %p3410_p5 = pnand %p3409_p3, %p4491_p2  ;;  %s3414_s10 = scalar_lea.vmem %s3413_s15, 256 }
 0x8e7   : > { %p3415_p10 = scmp.lt.s32.totalorder %s2250_s14, %s3413_s15  ;;  %p3416_p8 = scmp.lt.s32.totalorder %s3414_s10, %s3408_s29 }
 0x8e8   : > { %p3411_p11 = pneg %p3410_p5 }
 0x8e9   : > { %p3417_p1 = por %p3416_p8, %p3415_p10 }
 0x8eb   : > { %p3418_p4 = pnand %p3417_p1, %p3411_p11 }
 0x8ed   : > { %3421 = shalt.err (!%p3418_p4)
}
 0x8ee   : > { %s3422_s17 = scalar_lea.hbm %s4369_s30, 128  ;;  %s3426_s20 = scalar_lea.hbm %s4468_s5, 256 }
 0x8ef   : > { %p3423_p7 = scmp.ne.s32.totalorder %s4369_s30, %s3422_s17  ;;  %p3427_p9 = scmp.lt.u32.totalorder %s4369_s30, %s4468_s5 }
 0x8f0   : > { %p3428_p6 = scmp.lt.u32.totalorder %s3426_s20, %s3422_s17  ;;  %p3430_p3 = scmp.lt.u32.totalorder %s3422_s17, %s4369_s30 }
 0x8f1   : > { %p3424_p12 = pnand %p3423_p7, %p4491_p2 }
 0x8f2   : > { %p3429_p0 = por %p3428_p6, %p3427_p9 }
 0x8f3   : > { %p3425_p13 = pneg %p3424_p12 }
 0x8f4   : > { %p3431_p5 = por %p3430_p3, %p3429_p0 }
 0x8f6   : > { %p3432_p11 = pnand %p3431_p5, %p3425_p13 }
 0x8f8   : > { %3435 = shalt.err (!%p3432_p11)
}
 0x8f9   : > { %3121 = dma.vmem_to_hbm [thread:$0]  (%p4491_p2), %s2250_s14, 128, %s4369_s30, %s4375_s13  }
 0x8fa   : > { %s3547_s29 = smov [#allocation10]   ;;  %p4492_p8 = scmp.eq.s32.totalorder %s3682_s26, 1 }
 0x8fb   : > { %s2233_s9 = sshll.u32 %s3547_s29, 4  ;;  %s2234_s9 = int_to_ptr.vmem [resolvable:$true] %s2233_s9 }
 0x8fc   : > { %s3436_s15 = scalar_lea.vmem %s2234_s9, 1024  ;;  %p3443_p7 = scmp.lt.s32.totalorder %s2234_s9, %s2234_s9 }
 0x8fd   : > { %p3437_p10 = scmp.ne.s32.totalorder %s2234_s9, %s3436_s15  ;;  %p3444_p12 = scmp.lt.s32.totalorder %s3436_s15, %s3436_s15 }
 0x8ff   : > { %p3438_p1 = pnand %p3437_p10, %p4492_p8  ;;  %p3445_p9 = por %p3444_p12, %p3443_p7 }
 0x901   : > { %p3439_p4 = pneg %p3438_p1 }
 0x903   : > { %p3446_p6 = pnand %p3445_p9, %p3439_p4 }
 0x905   : > { %3449 = shalt.err (!%p3446_p6)
}
 0x906   : > { %s3450_s12 = scalar_lea.hbm %s4467_s4, 1024  ;;  %p4493_p0 = pmov %p4492_p8 }
 0x907   : > { %p3451_p13 = scmp.ne.s32.totalorder %s4467_s4, %s3450_s12  ;;  %p3456_p11 = scmp.lt.u32.totalorder %s3450_s12, %s4467_s4 }
 0x909   : > { %p3452_p3 = pnand %p3451_p13, %p4493_p0 }
 0x90b   : > { %p3453_p5 = pneg %p3452_p3 }
 0x90d   : > { %p3458_p10 = pnand %p3456_p11, %p3453_p5 }
 0x90f   : > { %3461 = shalt.err (!%p3458_p10)
}
 0x910   : > { %s3548_s27 = smov 128   ;;  %s3549_s19 = smov 8  }
 0x911   : > { %p4494_p8 = pmov %p4493_p0  ;;  %s4418_s18 = scalar_lea.hbm %s4469_s6, %s2464_s7 }
 0x912   : > { %s2262_s12 = sshll.u32 %s340_s16, 4  ;;  %s3550_s14 = smov [#allocation13]   ;;  %s2263_s12 = int_to_ptr.vmem [resolvable:$true] %s2262_s12 }
 0x913   : > { %3120 = dma.vmem_to_hbm [thread:$0]  (%p4494_p8), %s2234_s9, 1024, %s4467_s4, [#allocation6], %s3548_s27, %s3548_s27, %s3549_s19  }
 0x914   : > { %s3462_s30 = scalar_lea.vmem %s2263_s12, 128  ;;  %s3466_s20 = sshll.u32 %s3550_s14, 4  ;;  %s3467_s20 = int_to_ptr.vmem [resolvable:$false] %s3466_s20 }
 0x915   : > { %p3463_p1 = scmp.ne.s32.totalorder %s2263_s12, %s3462_s30  ;;  %s3468_s0 = scalar_lea.vmem %s3467_s20, 256 }
 0x916   : > { %p3469_p12 = scmp.lt.s32.totalorder %s2263_s12, %s3467_s20  ;;  %p3470_p9 = scmp.lt.s32.totalorder %s3468_s0, %s3462_s30 }
 0x917   : > { %p3464_p4 = pnand %p3463_p1, %p4491_p2 }
 0x918   : > { %p3471_p6 = por %p3470_p9, %p3469_p12 }
 0x919   : > { %p3465_p7 = pneg %p3464_p4 }
 0x91b   : > { %p3472_p13 = pnand %p3471_p6, %p3465_p7 }
 0x91d   : > { %3475 = shalt.err (!%p3472_p13)
}
 0x91e   : > { %s3476_s11 = scalar_lea.hbm %s4418_s18, 128  ;;  %s3480_s9 = scalar_lea.hbm %s4469_s6, 256 }
 0x91f   : > { %p3477_p0 = scmp.ne.s32.totalorder %s4418_s18, %s3476_s11  ;;  %p3481_p11 = scmp.lt.u32.totalorder %s4418_s18, %s4469_s6 }
 0x920   : > { %p3482_p10 = scmp.lt.u32.totalorder %s3480_s9, %s3476_s11  ;;  %p3484_p1 = scmp.lt.u32.totalorder %s3476_s11, %s4418_s18 }
 0x921   : > { %p3478_p3 = pnand %p3477_p0, %p4491_p2 }
 0x922   : > { %p3483_p8 = por %p3482_p10, %p3481_p11 }
 0x923   : > { %p3479_p5 = pneg %p3478_p3 }
 0x924   : > { %p3485_p4 = por %p3484_p1, %p3483_p8 }
 0x926   : > { %p3486_p7 = pnand %p3485_p4, %p3479_p5 }
 0x928   : > { %3489 = shalt.err (!%p3486_p7)
}
 0x929   : > { %3122 = dma.vmem_to_hbm [thread:$0]  (%p4491_p2), %s2263_s12, 128, %s4418_s18, %s4375_s13  }
 0x92a   : > { %p4495_p12 = scmp.eq.s32.totalorder %s3682_s26, 1 }
 0x92c   : > { %3515 = dma.done.wait (%p4495_p12), [#allocation6], 1024   ;;  %p4496_p9 = pmov %p4495_p12 }
 0x92e   : > { %3517 = vsyncadd (%p4496_p9), [#allocation6], 4294966272 }
 0x92f PF: > { %s4497_s0 = sadd.s32 4294967294, %s3536_s24   ;;  %p4498_p6 = scmp.ne.s32.totalorder %s4480_s21, 0 }
 0x930   : > { %s2278_s29 = sand.u32 1, %s4497_s0   ;;  %p4499_p13 = scmp.ge.s32.totalorder %s3536_s24, 2 }
 0x931   : > { %s2279_s15 = scalar_lea.sflag [#allocation12], %s2278_s29 }
 0x932   : > { %p3139_p0 = pnand %p4499_p13, %p4498_p6 }
 0x934   : > { %3519 = dma.done.wait (!%p3139_p0), %s2279_s15, 256  }
 0x935   : > { %3521 = vsyncadd (!%p3139_p0), %s2279_s15, 4294967040  ;;  %p22_p2 = scmp.ge.s32.totalorder %s3607_s25, 4   ;;  %s4500_s21 = smov %s3528_s22 }
 0x936   : > { %s4501_s22 = smov %s3532_s23  ;;  %s4502_s23 = smov %s3618_s28 }
 0x937   : > { %s4503_s24 = smov %s3607_s25  ;;  %24 = sbr.rel (!%p22_p2) target bundleno = 9 (0x9), region = 146 }
 0x93e   :  { %2293 = vsyncpa [#allocation5], 1 }
 0x93f   :  { %2295 = vsyncpa [#allocation5 + $0x1], 1 }
 0x940   :  { %2296 = vsyncpa [#allocation8], 1 }
 0x941   :  { %2298 = vsyncpa [#allocation8 + $0x1], 1 }
 0x942   :  { %2299 = vsyncpa [#allocation6], 1 }
 0x943   :  { %2301 = vsyncpa [#allocation6 + $0x1], 1 }
 0x944   :  { %2302 = vsyncpa [#allocation12], 1 }
 0x945   :  { %2304 = vsyncpa [#allocation12 + $0x1], 1 }

</bundles_post_ra>
